<compile_context>
chip_gen: v6e
topology: v6e:2x2x1
jax: 0.10.0
libtpu: 0.0.40
codegen_flags: <defaults>
</compile_context>

<pallas_src>
import jax
import jax.numpy as jnp
from jax import lax
from jax.experimental import pallas as pl
from jax.experimental.pallas import tpu as pltpu

# ---- model hyper-parameters (small, TPU-tile friendly) ----
BATCH = 2
SEQ = 16
D_MODEL = 128
N_HEADS = 4
HEAD_DIM = D_MODEL // N_HEADS
DIM_FF = 256
LN_EPS = 1e-6
ROWS = BATCH * SEQ  # 32 flattened rows per (single) grid step


def _layernorm(x, eps):
    # Pure normalization (affine folded into the following matmul).
    # Single-pass variance: E[x^2] - mu^2.
    mu = jnp.mean(x, axis=-1, keepdims=True)
    var = jnp.mean(x * x, axis=-1, keepdims=True) - mu * mu
    return (x - mu) * lax.rsqrt(var + eps)


def encoder_layer_kernel(
    x_ref,
    wqkv_ref, bqkv_ref,
    wo_ref, bo_ref,
    w1_ref, b1_ref, w2_ref, b2_ref,
    out_ref,
):
    """Whole flattened batch (ROWS, D_MODEL) processed in one step."""
    x = x_ref[...].astype(jnp.float32)                        # (R, D) f32

    # ---------------- multi-head attention sub-layer (pre-norm) ----------------
    # LN1 affine is folded into Wqkv / bqkv (done once on host in pack_params).
    xn = _layernorm(x, LN_EPS)

    # Single fused QKV matmul (bf16 MXU operands, f32 accumulation).
    qkv = jnp.dot(xn.astype(jnp.bfloat16), wqkv_ref[...],
                  preferred_element_type=jnp.float32) + bqkv_ref[...]   # (R, 3D)

    # Head split paid ONCE: (R, D) -> (B*H, S, hd), heads folded into one batch dim.
    def to_heads(t):
        t = t.reshape(BATCH, SEQ, N_HEADS, HEAD_DIM)
        t = jnp.transpose(t, (0, 2, 1, 3))                     # (B, H, S, hd)
        return t.reshape(BATCH * N_HEADS, SEQ, HEAD_DIM).astype(jnp.bfloat16)

    # q already carries the 1/sqrt(d_model) scale (folded into Wq / bq).
    qh = to_heads(qkv[:, :D_MODEL])
    kh = to_heads(qkv[:, D_MODEL:2 * D_MODEL])
    vh = to_heads(qkv[:, 2 * D_MODEL:])

    # One batched matmul for ALL (batch, head) score blocks (no K transpose).
    scores = jnp.einsum('gqd,gkd->gqk', qh, kh,
                        preferred_element_type=jnp.float32)    # (B*H, S, S) f32

    # Softmax vectorized over the whole (B*H, S, S) tensor, f32 (v5e-safe),
    # divide replaced by EUP approx reciprocal.
    m = jnp.max(scores, axis=-1, keepdims=True)
    p = jnp.exp(scores - m)
    p = p * pl.reciprocal(jnp.sum(p, axis=-1, keepdims=True), approx=True)

    # One batched P@V matmul.
    o = jnp.einsum('gqk,gkd->gqd', p.astype(jnp.bfloat16), vh,
                   preferred_element_type=jnp.float32)         # (B*H, S, hd) f32

    # Repack heads along the 128-lane dim (lane-dense (R, D)) and do ONE
    # (R,128)@(128,128) output projection against the full Wo.
    o = o.reshape(BATCH, N_HEADS, SEQ, HEAD_DIM)
    o = jnp.transpose(o, (0, 2, 1, 3)).reshape(ROWS, D_MODEL)
    mha = jnp.dot(o.astype(jnp.bfloat16), wo_ref[...],
                  preferred_element_type=jnp.float32) + bo_ref[...]

    h1 = x + mha                                               # residual (dropout = identity)

    # ---------------- feed-forward sub-layer (pre-norm) ----------------
    # LN2 affine is folded into W1 / b1.
    hn = _layernorm(h1, LN_EPS)
    ff = jnp.dot(hn.astype(jnp.bfloat16), w1_ref[...],
                 preferred_element_type=jnp.float32) + b1_ref[...]
    ff = jnp.maximum(ff, 0.0)                                  # relu activation
    ff = jnp.dot(ff.astype(jnp.bfloat16), w2_ref[...],
                 preferred_element_type=jnp.float32) + b2_ref[...]

    out_ref[...] = (h1 + ff).astype(out_ref.dtype)             # residual (dropout = identity)


def pack_params(params):
    """Fold attention scale + LayerNorm affines into weights, fuse QKV, cast to bf16."""
    (ln1_w, ln1_b, wq, bq, wk, bk, wv, bv, wo, bo,
     ln2_w, ln2_b, w1, b1, w2, b2) = params

    scale = 1.0 / (D_MODEL ** 0.5)  # NOTE: reference scales by sqrt(d_model), not sqrt(head_dim)
    wqkv = jnp.concatenate([wq * scale, wk, wv], axis=1)       # (D, 3D) f32
    bqkv = jnp.concatenate([bq * scale, bk, bv], axis=1)       # (1, 3D) f32

    # Fold LN1 affine:  (n*g + b) @ W + c  =  n @ (g[:,None]*W) + (b @ W + c)
    wqkv_f = (wqkv * ln1_w[0][:, None]).astype(jnp.bfloat16)
    bqkv_f = bqkv + ln1_b @ wqkv                               # (1, 3D) f32

    # Fold LN2 affine into the first FF matmul.
    w1_f = (w1 * ln2_w[0][:, None]).astype(jnp.bfloat16)
    b1_f = b1 + ln2_b @ w1                                     # (1, FF) f32

    return (wqkv_f, bqkv_f,
            wo.astype(jnp.bfloat16), bo,
            w1_f, b1_f,
            w2.astype(jnp.bfloat16), b2)


def transformer_encoder_layer(x, params):
    B, S, D = x.shape
    assert (B, S, D) == (BATCH, SEQ, D_MODEL)

    packed = pack_params(params)
    x2d = x.reshape(ROWS, D)

    def whole(arr):
        nd = arr.ndim
        return pl.BlockSpec(arr.shape, lambda i, _nd=nd: (0,) * _nd)

    fn = pl.pallas_call(
        encoder_layer_kernel,
        out_shape=jax.ShapeDtypeStruct((ROWS, D), x.dtype),
        grid_spec=pltpu.PrefetchScalarGridSpec(
            num_scalar_prefetch=0,
            grid=(1,),  # whole batch in one step on all generations
            in_specs=[pl.BlockSpec((ROWS, D), lambda i: (0, 0))]
                     + [whole(p) for p in packed],
            out_specs=pl.BlockSpec((ROWS, D), lambda i: (0, 0)),
        ),
        compiler_params=pltpu.CompilerParams(
            dimension_semantics=("arbitrary",),
        ),
    )
    return fn(x2d, *packed).reshape(B, S, D)


def make_params(key):
    """Deterministic synthetic parameters (shapes from the module __init__), f32."""
    ks = jax.random.split(key, 16)
    s = 0.05
    ln1_w = jnp.ones((1, D_MODEL), jnp.float32) + s * jax.random.normal(ks[0], (1, D_MODEL))
    ln1_b = s * jax.random.normal(ks[1], (1, D_MODEL))
    wq = s * jax.random.normal(ks[2], (D_MODEL, D_MODEL))
    bq = s * jax.random.normal(ks[3], (1, D_MODEL))
    wk = s * jax.random.normal(ks[4], (D_MODEL, D_MODEL))
    bk = s * jax.random.normal(ks[5], (1, D_MODEL))
    wv = s * jax.random.normal(ks[6], (D_MODEL, D_MODEL))
    bv = s * jax.random.normal(ks[7], (1, D_MODEL))
    wo = s * jax.random.normal(ks[8], (D_MODEL, D_MODEL))
    bo = s * jax.random.normal(ks[9], (1, D_MODEL))
    ln2_w = jnp.ones((1, D_MODEL), jnp.float32) + s * jax.random.normal(ks[10], (1, D_MODEL))
    ln2_b = s * jax.random.normal(ks[11], (1, D_MODEL))
    w1 = s * jax.random.normal(ks[12], (D_MODEL, DIM_FF))
    b1 = s * jax.random.normal(ks[13], (1, DIM_FF))
    w2 = s * jax.random.normal(ks[14], (DIM_FF, D_MODEL))
    b2 = s * jax.random.normal(ks[15], (1, D_MODEL))
    return tuple(p.astype(jnp.float32) for p in
                 (ln1_w, ln1_b, wq, bq, wk, bk, wv, bv, wo, bo,
                  ln2_w, ln2_b, w1, b1, w2, b2))


def reference_forward(x, params):
    """Pure-JAX f32 reference mirroring the PyTorch module (eval mode, e_mask=None)."""
    (ln1_w, ln1_b, wq, bq, wk, bk, wv, bv, wo, bo,
     ln2_w, ln2_b, w1, b1, w2, b2) = params

    def ln(z, w, b):
        mu = jnp.mean(z, axis=-1, keepdims=True)
        var = jnp.mean((z - mu) ** 2, axis=-1, keepdims=True)
        return (z - mu) / jnp.sqrt(var + LN_EPS) * w[0] + b[0]

    xn = ln(x, ln1_w, ln1_b)
    q = xn @ wq + bq[0]
    k = xn @ wk + bk[0]
    v = xn @ wv + bv[0]
    B, S, D = x.shape
    qh = q.reshape(B, S, N_HEADS, HEAD_DIM).transpose(0, 2, 1, 3)
    kh = k.reshape(B, S, N_HEADS, HEAD_DIM).transpose(0, 2, 1, 3)
    vh = v.reshape(B, S, N_HEADS, HEAD_DIM).transpose(0, 2, 1, 3)
    scores = jnp.einsum("bhqd,bhkd->bhqk", qh, kh) / (D_MODEL ** 0.5)
    p = jax.nn.softmax(scores, axis=-1)
    o = jnp.einsum("bhqk,bhkd->bhqd", p, vh).transpose(0, 2, 1, 3).reshape(B, S, D)
    mha = o @ wo + bo[0]
    h1 = x + mha
    hn = ln(h1, ln2_w, ln2_b)
    ff = jnp.maximum(hn @ w1 + b1[0], 0.0) @ w2 + b2[0]
    return h1 + ff


if __name__ == "__main__":
    key = jax.random.PRNGKey(0)
    kx, kp = jax.random.split(key)
    x = jax.random.normal(kx, (BATCH, SEQ, D_MODEL), dtype=jnp.float32)
    params = make_params(kp)

    out = transformer_encoder_layer(x, params)
    out = jax.block_until_ready(out)

    ref = reference_forward(x, params)
    assert out.shape == (BATCH, SEQ, D_MODEL)
    # bf16 MXU inputs (f32 accumulation) + folded LN affine + approx reciprocal
    # => relaxed tolerance.
    assert jnp.allclose(out, ref, atol=1e-2, rtol=1e-2), \
        f"max err {jnp.max(jnp.abs(out - ref))}"

    print("KERNEL_OK")
</pallas_src>

<mosaic_0001>
module attributes {stable_mosaic.version = 11 : i64} {
  func.func @encoder_layer_kernel(%arg0: i32, %arg1: memref<32x128xf32, #tpu.memory_space<vmem>>, %arg2: memref<128x384xbf16, #tpu.memory_space<vmem>>, %arg3: memref<1x384xf32, #tpu.memory_space<vmem>>, %arg4: memref<128x128xbf16, #tpu.memory_space<vmem>>, %arg5: memref<1x128xf32, #tpu.memory_space<vmem>>, %arg6: memref<128x256xbf16, #tpu.memory_space<vmem>>, %arg7: memref<1x256xf32, #tpu.memory_space<vmem>>, %arg8: memref<256x128xbf16, #tpu.memory_space<vmem>>, %arg9: memref<1x128xf32, #tpu.memory_space<vmem>>, %arg10: memref<32x128xf32, #tpu.memory_space<vmem>>) attributes {dimension_semantics = [#tpu.dimension_semantics<arbitrary>], iteration_bounds = array<i64: 1>, scalar_prefetch = 0 : i64, scratch_operands = 0 : i64, tpu.core_type = #tpu.core_type<tc>, window_params = [{pipeline_mode = #tpu.pipeline_mode<synchronous>, transform_indices = @transform_0, window_bounds = array<i64: 32, 128>}, {pipeline_mode = #tpu.pipeline_mode<synchronous>, transform_indices = @transform_1, window_bounds = array<i64: 128, 384>}, {pipeline_mode = #tpu.pipeline_mode<synchronous>, transform_indices = @transform_2, window_bounds = array<i64: 1, 384>}, {pipeline_mode = #tpu.pipeline_mode<synchronous>, transform_indices = @transform_3, window_bounds = array<i64: 128, 128>}, {pipeline_mode = #tpu.pipeline_mode<synchronous>, transform_indices = @transform_4, window_bounds = array<i64: 1, 128>}, {pipeline_mode = #tpu.pipeline_mode<synchronous>, transform_indices = @transform_5, window_bounds = array<i64: 128, 256>}, {pipeline_mode = #tpu.pipeline_mode<synchronous>, transform_indices = @transform_6, window_bounds = array<i64: 1, 256>}, {pipeline_mode = #tpu.pipeline_mode<synchronous>, transform_indices = @transform_7, window_bounds = array<i64: 256, 128>}, {pipeline_mode = #tpu.pipeline_mode<synchronous>, transform_indices = @transform_8, window_bounds = array<i64: 1, 128>}, {pipeline_mode = #tpu.pipeline_mode<synchronous>, transform_indices = @transform_9, window_bounds = array<i64: 32, 128>}]} {
    %c0 = arith.constant 0 : index
    %c0_0 = arith.constant 0 : index
    %0 = vector.load %arg1[%c0, %c0_0] : memref<32x128xf32, #tpu.memory_space<vmem>>, vector<32x128xf32>
    %cst = arith.constant dense<0.000000e+00> : vector<32xf32>
    %1 = vector.multi_reduction <add>, %0, %cst [1] : vector<32x128xf32> to vector<32xf32>
    %2 = vector.shape_cast %1 : vector<32xf32> to vector<32x1xf32>
    %cst_1 = arith.constant 1.280000e+02 : f32
    %3 = vector.broadcast %cst_1 : f32 to vector<32x1xf32>
    %4 = arith.divf %2, %3 : vector<32x1xf32>
    %5 = arith.mulf %0, %0 : vector<32x128xf32>
    %cst_2 = arith.constant dense<0.000000e+00> : vector<32xf32>
    %6 = vector.multi_reduction <add>, %5, %cst_2 [1] : vector<32x128xf32> to vector<32xf32>
    %7 = vector.shape_cast %6 : vector<32xf32> to vector<32x1xf32>
    %cst_3 = arith.constant 1.280000e+02 : f32
    %8 = vector.broadcast %cst_3 : f32 to vector<32x1xf32>
    %9 = arith.divf %7, %8 : vector<32x1xf32>
    %10 = arith.mulf %4, %4 : vector<32x1xf32>
    %11 = arith.subf %9, %10 : vector<32x1xf32>
    %12 = vector.broadcast %4 : vector<32x1xf32> to vector<32x128xf32>
    %13 = arith.subf %0, %12 : vector<32x128xf32>
    %cst_4 = arith.constant 9.99999997E-7 : f32
    %14 = vector.broadcast %cst_4 : f32 to vector<32x1xf32>
    %15 = arith.addf %11, %14 : vector<32x1xf32>
    %16 = math.rsqrt %15 : vector<32x1xf32>
    %17 = vector.broadcast %16 : vector<32x1xf32> to vector<32x128xf32>
    %18 = arith.mulf %13, %17 : vector<32x128xf32>
    %19 = arith.truncf %18 : vector<32x128xf32> to vector<32x128xbf16>
    %c0_5 = arith.constant 0 : index
    %c0_6 = arith.constant 0 : index
    %20 = vector.load %arg2[%c0_5, %c0_6] : memref<128x384xbf16, #tpu.memory_space<vmem>>, vector<128x384xbf16>
    %cst_7 = arith.constant dense<0.000000e+00> : vector<32x384xf32>
    %21 = tpu.matmul %19, %20, %cst_7 {dimension_numbers = #tpu.dot_dimension_numbers<[1], [0], [0], [1], [0, 0, 1, 1], [], []>} : vector<32x128xbf16>, vector<128x384xbf16>, vector<32x384xf32> -> vector<32x384xf32>
    %c0_8 = arith.constant 0 : index
    %c0_9 = arith.constant 0 : index
    %22 = vector.load %arg3[%c0_8, %c0_9] : memref<1x384xf32, #tpu.memory_space<vmem>>, vector<1x384xf32>
    %23 = vector.broadcast %22 : vector<1x384xf32> to vector<32x384xf32>
    %24 = arith.addf %21, %23 : vector<32x384xf32>
    %25 = vector.extract_strided_slice %24 {offsets = [0, 0], sizes = [32, 128], strides = [1, 1]} : vector<32x384xf32> to vector<32x128xf32>
    %26 = vector.shape_cast %25 : vector<32x128xf32> to vector<2x16x4x32xf32>
    %27 = tpu.transpose %26, [0, 2, 1, 3] : vector<2x16x4x32xf32> -> vector<2x4x16x32xf32>
    %28 = vector.shape_cast %27 : vector<2x4x16x32xf32> to vector<8x16x32xf32>
    %29 = arith.truncf %28 : vector<8x16x32xf32> to vector<8x16x32xbf16>
    %30 = vector.extract_strided_slice %24 {offsets = [0, 128], sizes = [32, 128], strides = [1, 1]} : vector<32x384xf32> to vector<32x128xf32>
    %31 = vector.shape_cast %30 : vector<32x128xf32> to vector<2x16x4x32xf32>
    %32 = tpu.transpose %31, [0, 2, 1, 3] : vector<2x16x4x32xf32> -> vector<2x4x16x32xf32>
    %33 = vector.shape_cast %32 : vector<2x4x16x32xf32> to vector<8x16x32xf32>
    %34 = arith.truncf %33 : vector<8x16x32xf32> to vector<8x16x32xbf16>
    %35 = vector.extract_strided_slice %24 {offsets = [0, 256], sizes = [32, 128], strides = [1, 1]} : vector<32x384xf32> to vector<32x128xf32>
    %36 = vector.shape_cast %35 : vector<32x128xf32> to vector<2x16x4x32xf32>
    %37 = tpu.transpose %36, [0, 2, 1, 3] : vector<2x16x4x32xf32> -> vector<2x4x16x32xf32>
    %38 = vector.shape_cast %37 : vector<2x4x16x32xf32> to vector<8x16x32xf32>
    %39 = arith.truncf %38 : vector<8x16x32xf32> to vector<8x16x32xbf16>
    "tpu.trace_start"() <{level = 10 : i32, message = "gqd,gkd->gqk"}> : () -> ()
    %cst_10 = arith.constant dense<0.000000e+00> : vector<8x16x16xf32>
    %40 = tpu.matmul %29, %34, %cst_10 {dimension_numbers = #tpu.dot_dimension_numbers<[2], [2], [1], [1], [0, 0, 0, 1, 1, 1], [0], [0]>} : vector<8x16x32xbf16>, vector<8x16x32xbf16>, vector<8x16x16xf32> -> vector<8x16x16xf32>
    "tpu.trace_stop"() : () -> ()
    %cst_11 = arith.constant dense<0xFF800000> : vector<8x16xf32>
    %41 = vector.multi_reduction <maximumf>, %40, %cst_11 [2] : vector<8x16x16xf32> to vector<8x16xf32>
    %42 = vector.shape_cast %41 : vector<8x16xf32> to vector<8x16x1xf32>
    %43 = vector.broadcast %42 : vector<8x16x1xf32> to vector<8x16x16xf32>
    %44 = arith.subf %40, %43 : vector<8x16x16xf32>
    %45 = math.exp %44 : vector<8x16x16xf32>
    %cst_12 = arith.constant dense<0.000000e+00> : vector<8x16xf32>
    %46 = vector.multi_reduction <add>, %45, %cst_12 [2] : vector<8x16x16xf32> to vector<8x16xf32>
    %47 = vector.shape_cast %46 : vector<8x16xf32> to vector<8x16x1xf32>
    %48 = tpu.reciprocal %47 {approx = true} : vector<8x16x1xf32> -> vector<8x16x1xf32>
    %49 = vector.broadcast %48 : vector<8x16x1xf32> to vector<8x16x16xf32>
    %50 = arith.mulf %45, %49 : vector<8x16x16xf32>
    %51 = arith.truncf %50 : vector<8x16x16xf32> to vector<8x16x16xbf16>
    "tpu.trace_start"() <{level = 10 : i32, message = "gqk,gkd->gqd"}> : () -> ()
    %cst_13 = arith.constant dense<0.000000e+00> : vector<8x16x32xf32>
    %52 = tpu.matmul %51, %39, %cst_13 {dimension_numbers = #tpu.dot_dimension_numbers<[2], [1], [1], [2], [0, 0, 0, 1, 1, 2], [0], [0]>} : vector<8x16x16xbf16>, vector<8x16x32xbf16>, vector<8x16x32xf32> -> vector<8x16x32xf32>
    "tpu.trace_stop"() : () -> ()
    %53 = vector.shape_cast %52 : vector<8x16x32xf32> to vector<2x4x16x32xf32>
    %54 = tpu.transpose %53, [0, 2, 1, 3] : vector<2x4x16x32xf32> -> vector<2x16x4x32xf32>
    %55 = vector.shape_cast %54 : vector<2x16x4x32xf32> to vector<32x128xf32>
    %56 = arith.truncf %55 : vector<32x128xf32> to vector<32x128xbf16>
    %c0_14 = arith.constant 0 : index
    %c0_15 = arith.constant 0 : index
    %57 = vector.load %arg4[%c0_14, %c0_15] : memref<128x128xbf16, #tpu.memory_space<vmem>>, vector<128x128xbf16>
    %cst_16 = arith.constant dense<0.000000e+00> : vector<32x128xf32>
    %58 = tpu.matmul %56, %57, %cst_16 {dimension_numbers = #tpu.dot_dimension_numbers<[1], [0], [0], [1], [0, 0, 1, 1], [], []>} : vector<32x128xbf16>, vector<128x128xbf16>, vector<32x128xf32> -> vector<32x128xf32>
    %c0_17 = arith.constant 0 : index
    %c0_18 = arith.constant 0 : index
    %59 = vector.load %arg5[%c0_17, %c0_18] : memref<1x128xf32, #tpu.memory_space<vmem>>, vector<1x128xf32>
    %60 = vector.broadcast %59 : vector<1x128xf32> to vector<32x128xf32>
    %61 = arith.addf %58, %60 : vector<32x128xf32>
    %62 = arith.addf %0, %61 : vector<32x128xf32>
    %cst_19 = arith.constant dense<0.000000e+00> : vector<32xf32>
    %63 = vector.multi_reduction <add>, %62, %cst_19 [1] : vector<32x128xf32> to vector<32xf32>
    %64 = vector.shape_cast %63 : vector<32xf32> to vector<32x1xf32>
    %cst_20 = arith.constant 1.280000e+02 : f32
    %65 = vector.broadcast %cst_20 : f32 to vector<32x1xf32>
    %66 = arith.divf %64, %65 : vector<32x1xf32>
    %67 = arith.mulf %62, %62 : vector<32x128xf32>
    %cst_21 = arith.constant dense<0.000000e+00> : vector<32xf32>
    %68 = vector.multi_reduction <add>, %67, %cst_21 [1] : vector<32x128xf32> to vector<32xf32>
    %69 = vector.shape_cast %68 : vector<32xf32> to vector<32x1xf32>
    %cst_22 = arith.constant 1.280000e+02 : f32
    %70 = vector.broadcast %cst_22 : f32 to vector<32x1xf32>
    %71 = arith.divf %69, %70 : vector<32x1xf32>
    %72 = arith.mulf %66, %66 : vector<32x1xf32>
    %73 = arith.subf %71, %72 : vector<32x1xf32>
    %74 = vector.broadcast %66 : vector<32x1xf32> to vector<32x128xf32>
    %75 = arith.subf %62, %74 : vector<32x128xf32>
    %cst_23 = arith.constant 9.99999997E-7 : f32
    %76 = vector.broadcast %cst_23 : f32 to vector<32x1xf32>
    %77 = arith.addf %73, %76 : vector<32x1xf32>
    %78 = math.rsqrt %77 : vector<32x1xf32>
    %79 = vector.broadcast %78 : vector<32x1xf32> to vector<32x128xf32>
    %80 = arith.mulf %75, %79 : vector<32x128xf32>
    %81 = arith.truncf %80 : vector<32x128xf32> to vector<32x128xbf16>
    %c0_24 = arith.constant 0 : index
    %c0_25 = arith.constant 0 : index
    %82 = vector.load %arg6[%c0_24, %c0_25] : memref<128x256xbf16, #tpu.memory_space<vmem>>, vector<128x256xbf16>
    %cst_26 = arith.constant dense<0.000000e+00> : vector<32x256xf32>
    %83 = tpu.matmul %81, %82, %cst_26 {dimension_numbers = #tpu.dot_dimension_numbers<[1], [0], [0], [1], [0, 0, 1, 1], [], []>} : vector<32x128xbf16>, vector<128x256xbf16>, vector<32x256xf32> -> vector<32x256xf32>
    %c0_27 = arith.constant 0 : index
    %c0_28 = arith.constant 0 : index
    %84 = vector.load %arg7[%c0_27, %c0_28] : memref<1x256xf32, #tpu.memory_space<vmem>>, vector<1x256xf32>
    %85 = vector.broadcast %84 : vector<1x256xf32> to vector<32x256xf32>
    %86 = arith.addf %83, %85 : vector<32x256xf32>
    %cst_29 = arith.constant 0.000000e+00 : f32
    %87 = vector.broadcast %cst_29 : f32 to vector<32x256xf32>
    %88 = arith.maximumf %86, %87 : vector<32x256xf32>
    %89 = arith.truncf %88 : vector<32x256xf32> to vector<32x256xbf16>
    %c0_30 = arith.constant 0 : index
    %c0_31 = arith.constant 0 : index
    %90 = vector.load %arg8[%c0_30, %c0_31] : memref<256x128xbf16, #tpu.memory_space<vmem>>, vector<256x128xbf16>
    %cst_32 = arith.constant dense<0.000000e+00> : vector<32x128xf32>
    %91 = tpu.matmul %89, %90, %cst_32 {dimension_numbers = #tpu.dot_dimension_numbers<[1], [0], [0], [1], [0, 0, 1, 1], [], []>} : vector<32x256xbf16>, vector<256x128xbf16>, vector<32x128xf32> -> vector<32x128xf32>
    %c0_33 = arith.constant 0 : index
    %c0_34 = arith.constant 0 : index
    %92 = vector.load %arg9[%c0_33, %c0_34] : memref<1x128xf32, #tpu.memory_space<vmem>>, vector<1x128xf32>
    %93 = vector.broadcast %92 : vector<1x128xf32> to vector<32x128xf32>
    %94 = arith.addf %91, %93 : vector<32x128xf32>
    %95 = arith.addf %62, %94 : vector<32x128xf32>
    %c0_35 = arith.constant 0 : index
    %c0_36 = arith.constant 0 : index
    %96 = vector.load %arg10[%c0_35, %c0_36] : memref<32x128xf32, #tpu.memory_space<vmem>>, vector<32x128xf32>
    tpu.vector_store %arg10[%c0_35, %c0_36], %95 {strides = array<i32>} : memref<32x128xf32, #tpu.memory_space<vmem>>, vector<32x128xf32>,
    return
  }
  func.func @transform_0(%arg0: i32) -> (i32, i32) {
    %c0_i32 = arith.constant 0 : i32
    %c0_i32_0 = arith.constant 0 : i32
    %c0_i32_1 = arith.constant 0 : i32
    return %c0_i32, %c0_i32_0 : i32, i32
  }
  func.func @transform_1(%arg0: i32) -> (i32, i32) {
    %c0_i32 = arith.constant 0 : i32
    %c0_i32_0 = arith.constant 0 : i32
    %c0_i32_1 = arith.constant 0 : i32
    return %c0_i32, %c0_i32_0 : i32, i32
  }
  func.func @transform_2(%arg0: i32) -> (i32, i32) {
    %c0_i32 = arith.constant 0 : i32
    %c0_i32_0 = arith.constant 0 : i32
    %c0_i32_1 = arith.constant 0 : i32
    return %c0_i32, %c0_i32_0 : i32, i32
  }
  func.func @transform_3(%arg0: i32) -> (i32, i32) {
    %c0_i32 = arith.constant 0 : i32
    %c0_i32_0 = arith.constant 0 : i32
    %c0_i32_1 = arith.constant 0 : i32
    return %c0_i32, %c0_i32_0 : i32, i32
  }
  func.func @transform_4(%arg0: i32) -> (i32, i32) {
    %c0_i32 = arith.constant 0 : i32
    %c0_i32_0 = arith.constant 0 : i32
    %c0_i32_1 = arith.constant 0 : i32
    return %c0_i32, %c0_i32_0 : i32, i32
  }
  func.func @transform_5(%arg0: i32) -> (i32, i32) {
    %c0_i32 = arith.constant 0 : i32
    %c0_i32_0 = arith.constant 0 : i32
    %c0_i32_1 = arith.constant 0 : i32
    return %c0_i32, %c0_i32_0 : i32, i32
  }
  func.func @transform_6(%arg0: i32) -> (i32, i32) {
    %c0_i32 = arith.constant 0 : i32
    %c0_i32_0 = arith.constant 0 : i32
    %c0_i32_1 = arith.constant 0 : i32
    return %c0_i32, %c0_i32_0 : i32, i32
  }
  func.func @transform_7(%arg0: i32) -> (i32, i32) {
    %c0_i32 = arith.constant 0 : i32
    %c0_i32_0 = arith.constant 0 : i32
    %c0_i32_1 = arith.constant 0 : i32
    return %c0_i32, %c0_i32_0 : i32, i32
  }
  func.func @transform_8(%arg0: i32) -> (i32, i32) {
    %c0_i32 = arith.constant 0 : i32
    %c0_i32_0 = arith.constant 0 : i32
    %c0_i32_1 = arith.constant 0 : i32
    return %c0_i32, %c0_i32_0 : i32, i32
  }
  func.func @transform_9(%arg0: i32) -> (i32, i32) {
    %c0_i32 = arith.constant 0 : i32
    %c0_i32_0 = arith.constant 0 : i32
    %c0_i32_1 = arith.constant 0 : i32
    return %c0_i32, %c0_i32_0 : i32, i32
  }
}

</mosaic_0001>

<bundles_post_ra>
// kernel: tpu_custom_call.1
= control target key start
LH: loop header
LB: loop body
LE: loop exit
PB: predicated region body
PF: predicated region fallthrough
CT: control target
= control target key end

     0   :  { %14 = vsyncpa [#allocation3], 0  ;;  %s6190_s0 = inlined_call_operand.hbm [shape: f32[32,128], index: 0, kind: input, shape index: {}]   ;;  %s6191_s1 = inlined_call_operand.hbm [shape: bf16[128,384], index: 1, kind: input, shape index: {}]   ;;  %s6192_s2 = inlined_call_operand.vmem [shape: f32[1,384], index: 2, kind: input, shape index: {}]   ;;  %s6193_s3 = inlined_call_operand.hbm [shape: bf16[128,128], index: 3, kind: input, shape index: {}]   ;;  %s6194_s4 = inlined_call_operand.vmem [shape: f32[1,128], index: 4, kind: input, shape index: {}]   ;;  %s6195_s5 = inlined_call_operand.hbm [shape: bf16[128,256], index: 5, kind: input, shape index: {}]   ;;  %s6196_s6 = inlined_call_operand.vmem [shape: f32[1,256], index: 6, kind: input, shape index: {}]   ;;  %s6197_s7 = inlined_call_operand.hbm [shape: bf16[256,128], index: 7, kind: input, shape index: {}]   ;;  %s6198_s8 = inlined_call_operand.vmem [shape: f32[1,128], index: 8, kind: input, shape index: {}]   ;;  %s6199_s9 = inlined_call_operand.hbm [shape: f32[32,128], index: 9, kind: output, shape index: {}]  }
   0x1   :  { %15 = vsyncpa [#allocation6], 0 }
   0x2   :  { %16 = vsyncpa [#allocation9], 0 }
   0x3   :  { %17 = vsyncpa [#allocation4], 0  ;;  %s4971_s30 = smov [#allocation5]  }
   0x4   :  { %s35_s10 = sshll.u32 %s4971_s30, 4  ;;  %s36_s10 = int_to_ptr.vmem [resolvable:$true] %s35_s10 }
   0x5   :  { %s4851_s11 = scalar_lea.vmem %s36_s10, 3072  ;;  %p4856_p1 = scmp.lt.s32.totalorder %s36_s10, %s36_s10 }
   0x6   :  { %p4852_p0 = scmp.ne.s32.totalorder %s36_s10, %s4851_s11  ;;  %p4857_p2 = scmp.lt.s32.totalorder %s4851_s11, %s4851_s11 }
   0x8   :  { %p4858_p3 = por %p4857_p2, %p4856_p1 }
   0xa   :  { %p4859_p4 = pnand %p4858_p3, %p4852_p0 }
   0xc   :  { %4862 = shalt.err (!%p4859_p4)
}
   0xd   :  { %s4972_s12 = smov 192   ;;  %s4973_s13 = smov 12  }
   0xe   :  { %41 = dma.hbm_to_vmem [thread:$0]  %s6191_s1, 3072, %s36_s10, [#allocation6], %s4972_s12, %s4972_s12, %s4973_s13  }
   0xf   :  { %s4974_s16 = smov [#allocation8]   ;;  %s4975_s18 = smov [#allocation2]  }
  0x10   :  { %s63_s17 = sshll.u32 %s4974_s16, 4  ;;  %s23_s19 = sshll.u32 %s4975_s18, 4  ;;  %s64_s17 = int_to_ptr.vmem [resolvable:$true] %s63_s17  ;;  %s24_s19 = int_to_ptr.vmem [resolvable:$true] %s23_s19 }
  0x11   :  { %s4871_s20 = scalar_lea.vmem %s64_s17, 2048  ;;  %p4876_p6 = scmp.lt.s32.totalorder %s64_s17, %s64_s17 }
  0x12   :  { %p4872_p5 = scmp.ne.s32.totalorder %s64_s17, %s4871_s20  ;;  %p4877_p7 = scmp.lt.s32.totalorder %s4871_s20, %s4871_s20 }
  0x14   :  { %p4878_p8 = por %p4877_p7, %p4876_p6 }
  0x16   :  { %p4879_p9 = pnand %p4878_p8, %p4872_p5 }
  0x18   :  { %4882 = shalt.err (!%p4879_p9)
}
  0x19   :  { %s4976_s21 = smov 128   ;;  %s4977_s22 = smov 8  }
  0x1a   :  { %69 = dma.hbm_to_vmem [thread:$0]  %s6195_s5, 2048, %s64_s17, [#allocation9], %s4976_s21, %s4976_s21, %s4977_s22  }
  0x1b   :  { %s4891_s1 = scalar_lea.vmem %s24_s19, 512  ;;  %p4896_p11 = scmp.lt.s32.totalorder %s24_s19, %s24_s19 }
  0x1c   :  { %p4892_p10 = scmp.ne.s32.totalorder %s24_s19, %s4891_s1  ;;  %p4897_p12 = scmp.lt.s32.totalorder %s4891_s1, %s4891_s1 }
  0x1e   :  { %p4898_p13 = por %p4897_p12, %p4896_p11 }
  0x20   :  { %p4899_p0 = pnand %p4898_p13, %p4892_p10 }
  0x22   :  { %4902 = shalt.err (!%p4899_p0)
}
  0x23   :  { %29 = dma.hbm_to_vmem [thread:$0]  %s6190_s0, 512, %s24_s19, [#allocation3], %s4976_s21, %s4976_s21, %s4977_s22  }
  0x24   :  { %s4978_s27 = smov [#allocation7]  }
  0x25   :  { %s49_s28 = sshll.u32 %s4978_s27, 4  ;;  %s50_s28 = int_to_ptr.vmem [resolvable:$true] %s49_s28 }
  0x26   :  { %s4911_s29 = scalar_lea.vmem %s50_s28, 1024  ;;  %p4916_p2 = scmp.lt.s32.totalorder %s50_s28, %s50_s28 }
  0x27   :  { %p4912_p1 = scmp.ne.s32.totalorder %s50_s28, %s4911_s29  ;;  %p4917_p3 = scmp.lt.s32.totalorder %s4911_s29, %s4911_s29 }
  0x29   :  { %p4918_p4 = por %p4917_p3, %p4916_p2 }
  0x2b   :  { %p4919_p5 = pnand %p4918_p4, %p4912_p1 }
  0x2d   :  { %4922 = shalt.err (!%p4919_p5)
}
  0x2e   :  { %s4979_s5 = smov 64   ;;  %s4980_s30 = smov 4  }
  0x2f   :  { %55 = dma.hbm_to_vmem [thread:$0]  %s6193_s3, 1024, %s50_s28, [#allocation6], %s4979_s5, %s4979_s5, %s4980_s30  }
  0x30   :  { %s4981_s12 = smov [#allocation10]  }
  0x31   :  { %s77_s0 = sshll.u32 %s4981_s12, 4  ;;  %s78_s0 = int_to_ptr.vmem [resolvable:$true] %s77_s0 }
  0x32   :  { %s4931_s13 = scalar_lea.vmem %s78_s0, 2048  ;;  %p4936_p7 = scmp.lt.s32.totalorder %s78_s0, %s78_s0 }
  0x33   :  { %p4932_p6 = scmp.ne.s32.totalorder %s78_s0, %s4931_s13  ;;  %p4937_p8 = scmp.lt.s32.totalorder %s4931_s13, %s4931_s13 }
  0x35   :  { %p4938_p9 = por %p4937_p8, %p4936_p7 }
  0x37   :  { %p4939_p10 = pnand %p4938_p9, %p4932_p6 }
  0x39   :  { %4942 = shalt.err (!%p4939_p10)
}
  0x3a   :  { %83 = dma.hbm_to_vmem [thread:$0]  %s6197_s7, 2048, %s78_s0, [#allocation9], %s4979_s5, %s4979_s5, %s4980_s30  }
  0x3b   :  { %4963 = dma.done.wait [#allocation3], 512  }
  0x3c   :  { %4964 = vsyncadd [#allocation3], 4294966784 }
  0x3d   :  { %4965 = dma.done.wait [#allocation6], 4096  }
  0x3e   :  { %4966 = vsyncadd [#allocation6], 4294963200 }
  0x3f   :  { %4967 = dma.done.wait [#allocation9], 4096  }
  0x40   :  { %4968 = vsyncadd [#allocation9], 4294963200  ;;  %v5065_v0 = vld [vmem:[#allocation2] sm:$0xff]  ;;  %v5067_v1 = vld [vmem:[#allocation2 + $0x8] sm:$0xff]  ;;  %v4982_v30 = vmov 0   ;;  %s4983_s16 = smov 96  }
  0x41   :  { %106 = vadd.xlane.f32.xlu0 %v5065_v0  ;;  %v119_v2 = vmul.f32 %v5065_v0, %v5065_v0  ;;  %v4679_v3 = vld [vmem:[#allocation5 + $0xac] ss:$12 sps:$4 sm:$0xff]   ;;  %v4681_v4 = vld [vmem:[#allocation5 + $0xa8] ss:$12 sps:$4 sm:$0xff]   ;;  %v120_v5 = vmul.f32 %v5067_v1, %v5067_v1  ;;  %v4684_v11 = vld [vmem:[#allocation5 + $0x90] ss:$12 sps:$4 sm:$0xff]   ;;  %370 = vmatprep.mubr.bf16.mxu0 %v4982_v30 }
  0x42   :  { %v5074_v6 = vld [vmem:[#allocation2 + $0x10] sm:$0xff]  ;;  %338 = vmatprep.subr.bf16.mxu0 %v4679_v3  ;;  %v5077_v7 = vld [vmem:[#allocation2 + $0x18] sm:$0xff]  ;;  %v4692_v17 = vld [vmem:[#allocation5 + $0x60] ss:$12 sps:$4 sm:$0xff]   ;;  %vm4986_vm0 = vmmov 0   ;;  %vm2216_vm1 = vcmask 261120  }
  0x43   :  { %123 = vadd.xlane.f32.xlu1 %v119_v2  ;;  %339 = vmatpush1.bf16.msra.mxu0 %v4681_v4  ;;  %v121_v8 = vmul.f32 %v5074_v6, %v5074_v6  ;;  %v122_v9 = vmul.f32 %v5077_v7, %v5077_v7  ;;  %v4682_v10 = vld [vmem:[#allocation5 + $0x94] ss:$12 sps:$4 sm:$0xff]   ;;  %v4685_v12 = vld [vmem:[#allocation5 + $0x7c] ss:$12 sps:$4 sm:$0xff]   ;;  %v4688_v14 = vld [vmem:[#allocation5 + $0x78] ss:$12 sps:$4 sm:$0xff]  }
  0x44   :  { %340 = vmatprep.subr.bf16.mxu0 %v4682_v10  ;;  %v4687_v13 = vld [vmem:[#allocation5 + $0xb0] ss:$12 sps:$4 sm:$0xff]   ;;  %v4691_v16 = vld [vmem:[#allocation5 + $0x98] ss:$12 sps:$4 sm:$0xff]   ;;  %v4695_v19 = vld [vmem:[#allocation5 + $0x80] ss:$12 sps:$4 sm:$0xff]  }
  0x45   :  { %108 = vadd.xlane.f32.xlu0 %v5067_v1  ;;  %4494 = vmatprep.subr.bf16.mxu1 %v4687_v13  ;;  %v4689_v15 = vld [vmem:[#allocation5 + $0x64] ss:$12 sps:$4 sm:$0xff]   ;;  %v4693_v18 = vld [vmem:[#allocation5 + $0x4c] ss:$12 sps:$4 sm:$0xff]   ;;  %v4696_v20 = vld [vmem:[#allocation5 + $0x48] ss:$12 sps:$4 sm:$0xff]  }
  0x46   :  { %4495 = vmatpush3.bf16.msra.mxu1 %v4687_v13  ;;  %v4697_v21 = vld [vmem:[#allocation5 + $0x34] ss:$12 sps:$4 sm:$0xff]   ;;  %v4700_v23 = vld [vmem:[#allocation5 + $0x30] ss:$12 sps:$4 sm:$0xff]   ;;  %v4704_v26 = vld [vmem:[#allocation5 + $0x18] ss:$12 sps:$4 sm:$0xff]  }
  0x47   :  { %125 = vadd.xlane.f32.xlu1 %v120_v5  ;;  %341 = vmatpush1.bf16.msra.mxu0 %v4684_v11  ;;  %v4699_v22 = vld [vmem:[#allocation5 + $0x68] ss:$12 sps:$4 sm:$0xff]   ;;  %v4703_v25 = vld [vmem:[#allocation5 + $0x50] ss:$12 sps:$4 sm:$0xff]   ;;  %v4707_v28 = vld [vmem:[#allocation5 + $0x38] ss:$12 sps:$4 sm:$0xff]  }
  0x48   :  { %342 = vmatprep.subr.bf16.mxu0 %v4685_v12  ;;  %4496 = vmatprep.subr.bf16.mxu1 %v4691_v16  ;;  %v4701_v24 = vld [vmem:[#allocation5 + $0x1c] ss:$12 sps:$4 sm:$0xff]   ;;  %v4705_v27 = vld [vmem:[#allocation5 + $0x4] ss:$12 sps:$4 sm:$0xff]   ;;  %v4708_v29 = vld [vmem:[#allocation5] ss:$12 sps:$4 sm:$0xff]  }
  0x49   :  { %110 = vadd.xlane.f32.xlu0 %v5074_v6  ;;  %v4709_v31 = vld [vmem:[#allocation5 + $0x20] ss:$12 sps:$4 sm:$0xff]   ;;  %v4710_v32 = vld [vmem:[#allocation5 + $0x8] ss:$12 sps:$4 sm:$0xff]   ;;  %vm2593_vm2 = vcmask 130048   ;;  %vm3726_vm3 = vcmask 523264  }
  0x4a   :  { %4497 = vmatpush3.bf16.msra.mxu1 %v4691_v16  ;;  %vm3731_vm4 = vcmask 785408  }
  0x4b   :  { %112 = vadd.xlane.f32.xlu1 %v5077_v7  ;;  %343 = vmatpush1.bf16.msra.mxu0 %v4688_v14 }
  0x4c   :  { %344 = vmatprep.subr.bf16.mxu0 %v4689_v15  ;;  %4498 = vmatprep.subr.bf16.mxu1 %v4695_v19 }
  0x4d   :  { %127 = vadd.xlane.f32.xlu0 %v121_v8 }
  0x4e   :  { %4499 = vmatpush3.bf16.msra.mxu1 %v4695_v19 }
  0x4f   :  { %129 = vadd.xlane.f32.xlu1 %v122_v9  ;;  %345 = vmatpush1.bf16.msra.mxu0 %v4692_v17 }
  0x50   :  { %346 = vmatprep.subr.bf16.mxu0 %v4693_v18  ;;  %4500 = vmatprep.subr.bf16.mxu1 %v4699_v22 }
  0x52   :  { %4501 = vmatpush3.bf16.msra.mxu1 %v4699_v22 }
  0x53   :  { %347 = vmatpush1.bf16.msra.mxu0 %v4696_v20  ;;  %4502 = vmatprep.subr.bf16.mxu1 %v4703_v25 }
  0x54   :  { %348 = vmatprep.subr.bf16.mxu0 %v4697_v21 }
  0x56   :  { %4503 = vmatpush3.bf16.msra.mxu1 %v4703_v25 }
  0x57   :  { %349 = vmatpush1.bf16.msra.mxu0 %v4700_v23  ;;  %4504 = vmatprep.subr.bf16.mxu1 %v4707_v28 }
  0x58   :  { %350 = vmatprep.subr.bf16.mxu0 %v4701_v24 }
  0x5a   :  { %4505 = vmatpush3.bf16.msra.mxu1 %v4707_v28 }
  0x5b   :  { %351 = vmatpush1.bf16.msra.mxu0 %v4704_v26  ;;  %4506 = vmatprep.subr.bf16.mxu1 %v4709_v31 }
  0x5c   :  { %352 = vmatprep.subr.bf16.mxu0 %v4705_v27 }
  0x5e   :  { %4507 = vmatpush3.bf16.msra.mxu1 %v4709_v31 }
  0x5f   :  { %353 = vmatpush1.bf16.msra.mxu0 %v4708_v29  ;;  %4508 = vmatprep.subr.bf16.mxu1 %v4710_v32 }
  0x62   :  { %4509 = vmatpush3.bf16.msra.mxu1 %v4710_v32 }
  0xca   :  { %v107_v33 = vpop.xlane.xlu0 %106 }
  0xcb   :  { %v115_v34 = vmul.f32 0.0078125, %v107_v33 }
  0xcc   :  { %v124_v35 = vpop.xlane.xlu1 %123 }
  0xcd   :  { %v135_v36 = vmul.f32 %v115_v34, %v115_v34  ;;  %v131_v37 = vmul.f32 0.0078125, %v124_v35  ;;  %v143_v62 = vsub.f32 %v5065_v0, %v115_v34  ;;  %v195_v0 = vlaneseq }
  0xce   :  { %v109_v38 = vpop.xlane.xlu0 %108 }
  0xcf   :  { %v139_v39 = vsub.f32 %v131_v37, %v135_v36  ;;  %v116_v40 = vmul.f32 0.0078125, %v109_v38 }
  0xd0   :  { %v126_v41 = vpop.xlane.xlu1 %125 }
  0xd1   :  { %v147_v42 = vadd.f32 1e-06, %v139_v39  ;;  %v136_v43 = vmul.f32 %v116_v40, %v116_v40  ;;  %v132_v44 = vmul.f32 0.0078125, %v126_v41  ;;  %v144_v63 = vsub.f32 %v5067_v1, %v116_v40 }
  0xd2   :  { %v111_v45 = vpop.xlane.xlu0 %110  ;;  %v5091_v1 = vshrl.u32 %v195_v0, 7 }
  0xd3   :  { %v140_v46 = vsub.f32 %v132_v44, %v136_v43  ;;  %v117_v47 = vmul.f32 0.0078125, %v111_v45  ;;  %4759 = vrsqrt.f32 %v147_v42  ;;  %v4985_v42 = vmov 0.0  }
  0xd4   :  { %v113_v48 = vpop.xlane.xlu1 %112  ;;  %v197_v15 = vsub.s32 0, %v5091_v1  ;;  %v201_v16 = vsub.s32 1, %v5091_v1  ;;  %v205_v20 = vsub.s32 2, %v5091_v1  ;;  %4514 = vmatprep.subr.bf16.mxu0 %v4985_v42  ;;  %4526 = vmatprep.subr.bf16.mxu1 %v4985_v42 }
  0xd5   :  { %v148_v49 = vadd.f32 1e-06, %v140_v46  ;;  %v137_v50 = vmul.f32 %v117_v47, %v117_v47  ;;  %v118_v51 = vmul.f32 0.0078125, %v113_v48  ;;  %v145_v8 = vsub.f32 %v5074_v6, %v117_v47  ;;  %v193_v6 = vld [vmem:[%s6192_s2] sm:$0x7]  ;;  %s4984_s2 = smov 32  }
  0xd6   :  { %v128_v52 = vpop.xlane.xlu0 %127  ;;  %v202_v17 = vrot.slane %v193_v6, %v201_v16  ;;  %v206_v24 = vrot.slane %v193_v6, %v205_v20  ;;  %v4987_v46 = vmov 1983009808  }
  0xd7   :  { %4761 = vrsqrt.f32 %v148_v49  ;;  %v138_v53 = vmul.f32 %v118_v51, %v118_v51  ;;  %v133_v54 = vmul.f32 0.0078125, %v128_v52  ;;  %v146_v10 = vsub.f32 %v5077_v7, %v118_v51 }
  0xd8   :  { %v130_v55 = vpop.xlane.xlu1 %129  ;;  %v198_v7 = vrot.slane %v193_v6, %v197_v15  ;;  %v483_v47 = vunpack.c.l.s4 %v4987_v46  ;;  %v4988_v49 = vmov 1934713408  }
  0xd9   :  { %v141_v56 = vsub.f32 %v133_v54, %v137_v50  ;;  %v134_v57 = vmul.f32 0.0078125, %v130_v55  ;;  %v515_v50 = vunpack.c.l.s4 %v4988_v49 }
  0xda   :  { %v484_v52 = vunpack.c.0.s8 %v483_v47 }
  0xdb   :  { %v149_v58 = vadd.f32 1e-06, %v141_v56  ;;  %v142_v59 = vsub.f32 %v134_v57, %v138_v53  ;;  %v516_v54 = vunpack.c.0.s8 %v515_v50 }
  0xdc   :  { %v5196_v56 = vsub.s32 %v484_v52, %v5091_v1 }
  0xdd   :  { %4763 = vrsqrt.f32 %v149_v58  ;;  %v150_v60 = vadd.f32 1e-06, %v142_v59 }
  0xdf   :  { %4765 = vrsqrt.f32 %v150_v60 }
  0xe0   :  { %v4760_v61 = vpop.eup %4759 }
  0xe1   :  { %v155_v3 = vmul.f32 %v4760_v61, %v143_v62  ;;  %v5201_v62 = vsub.s32 %v516_v54, %v5091_v1 }
  0xe4   :  { %v4762_v2 = vpop.eup %4761 }
  0xe5   :  { %v156_v4 = vmul.f32 %v4762_v2, %v144_v63 }
  0xe7   :  { %v159_v5 = vpack.c.bf16 %v156_v4, %v155_v3 }
  0xe9   :  { %371 = vmatmul.mubr.bf16.vlgmr.msra.gmra.mxu0 %v159_v5  ;;  %4510 = vmatprep.mubr.bf16.mxu1 %v159_v5 }
  0xea   :  { %v4764_v9 = vpop.eup %4763  ;;  %380 = vmatprep.mubr.bf16.mxu0 %v4982_v30 }
  0xeb   :  { %v157_v12 = vmul.f32 %v4764_v9, %v145_v8 }
  0xec   :  { %v4766_v11 = vpop.eup %4765 }
  0xed   :  { %v158_v13 = vmul.f32 %v4766_v11, %v146_v10 }
  0xef   :  { %v160_v14 = vpack.c.bf16 %v158_v13, %v157_v12 }
  0xf1   :  { %381 = vmatmul.mubr.bf16.gmra.mxu0 %v160_v14  ;;  %4511 = vmatmul.mubr.bf16.vlgmr.msra.gmra.mxu1 %v160_v14 }
  0xf2   :  { %4516 = vmatprep.mubr.msk.bf16.mxu0 %vm4986_vm0, %v4985_v42  ;;  %4528 = vmatprep.mubr.msk.bf16.mxu1 %vm4986_vm0, %v4985_v42 }
 0x1a9   :  { %v372_v18 = vpop.f32.mrf.mxu0 }
 0x1aa   :  { %v5102_v19 = vadd.f32 %v372_v18, %v198_v7 }
 0x1ab   :  { %v374_v21 = vpop.f32.mrf.mxu0 }
 0x1ac   :  { %v5105_v22 = vadd.f32 %v374_v21, %v202_v17  ;;  %444 = vrot.lane.b32.xlu0 %v5102_v19, %s4983_s16 }
 0x1ad   :  { %v376_v23 = vpop.f32.mrf.mxu0 }
 0x1ae   :  { %1048 = vrot.lane.b32.xlu1 %v5105_v22, %s4979_s5  ;;  %v5111_v25 = vadd.f32 %v376_v23, %v198_v7 }
 0x1af   :  { %v378_v26 = vpop.f32.mrf.mxu0 }
 0x1b0   :  { %1036 = vrot.lane.b32.xlu0 %v5105_v22, %s4983_s16  ;;  %v5119_v31 = vadd.f32 %v378_v26, %v202_v17 }
 0x1b1   :  { %v4512_v27 = vpop.f32.mrf.mxu1  ;;  %v382_v34 = vpop.f32.mrf.mxu0 }
 0x1b2   :  { %v5115_v28 = vadd.f32 %v4512_v27, %v206_v24  ;;  %446 = vrot.lane.b32.xlu1 %v5111_v25, %s4983_s16  ;;  %v5133_v35 = vadd.f32 %v382_v34, %v198_v7 }
 0x1b3   :  { %v425_v29 = vpop.f32.mrf.mxu1  ;;  %v384_v36 = vpop.f32.mrf.mxu0 }
 0x1b4   :  { %1060 = vrot.lane.b32.xlu0 %v5105_v22, %s4984_s2  ;;  %v5139_v37 = vadd.f32 %v384_v36, %v202_v17  ;;  %v5167_v43 = vadd.f32 %v425_v29, %v206_v24 }
 0x1b5   :  { %v4513_v32 = vpop.f32.mrf.mxu1  ;;  %v386_v38 = vpop.f32.mrf.mxu0 }
 0x1b6   :  { %v5123_v33 = vadd.f32 %v4513_v32, %v206_v24  ;;  %1038 = vrot.lane.b32.xlu1 %v5119_v31, %s4983_s16  ;;  %v5147_v39 = vadd.f32 %v386_v38, %v198_v7 }
 0x1b7   :  { %v388_v40 = vpop.f32.mrf.mxu0  ;;  %v428_v44 = vpop.f32.mrf.mxu1 }
 0x1b8   :  { %456 = vrot.lane.b32.xlu0 %v5102_v19, %s4979_s5  ;;  %v5153_v41 = vadd.f32 %v388_v40, %v202_v17  ;;  %v5179_v45 = vadd.f32 %v428_v44, %v206_v24 }
 0x1ba   :  { %1050 = vrot.lane.b32.xlu1 %v5119_v31, %s4979_s5 }
 0x1bc   :  { %468 = vrot.lane.b32.xlu0 %v5102_v19, %s4984_s2 }
 0x1be   :  { %1062 = vrot.lane.b32.xlu1 %v5119_v31, %s4984_s2 }
 0x1c0   :  { %448 = vrot.lane.b32.xlu0 %v5133_v35, %s4983_s16 }
 0x1c2   :  { %458 = vrot.lane.b32.xlu1 %v5111_v25, %s4979_s5 }
 0x1c4   :  { %1040 = vrot.lane.b32.xlu0 %v5139_v37, %s4983_s16 }
 0x1c6   :  { %470 = vrot.lane.b32.xlu1 %v5111_v25, %s4984_s2 }
 0x1c8   :  { %1052 = vrot.lane.b32.xlu0 %v5139_v37, %s4979_s5 }
 0x1ca   :  { %450 = vrot.lane.b32.xlu1 %v5147_v39, %s4983_s16 }
 0x1cc   :  { %1064 = vrot.lane.b32.xlu0 %v5139_v37, %s4984_s2 }
 0x1ce   :  { %1042 = vrot.lane.b32.xlu1 %v5153_v41, %s4983_s16 }
 0x1d0   :  { %460 = vrot.lane.b32.xlu0 %v5133_v35, %s4979_s5 }
 0x1d2   :  { %1054 = vrot.lane.b32.xlu1 %v5153_v41, %s4979_s5 }
 0x1d4   :  { %472 = vrot.lane.b32.xlu0 %v5133_v35, %s4984_s2 }
 0x1d6   :  { %1066 = vrot.lane.b32.xlu1 %v5153_v41, %s4984_s2 }
 0x1d8   :  { %1628 = vrot.lane.b32.xlu0 %v5167_v43, %s4983_s16 }
 0x1da   :  { %462 = vrot.lane.b32.xlu1 %v5147_v39, %s4979_s5 }
 0x1dc   :  { %1652 = vrot.lane.b32.xlu0 %v5167_v43, %s4984_s2 }
 0x1de   :  { %474 = vrot.lane.b32.xlu1 %v5147_v39, %s4984_s2 }
 0x1e2   :  { %1630 = vrot.lane.b32.xlu1 %v5179_v45, %s4983_s16 }
 0x1e6   :  { %1640 = vrot.lane.b32.xlu1 %v5167_v43, %s4979_s5 }
 0x1ea   :  { %1642 = vrot.lane.b32.xlu1 %v5179_v45, %s4979_s5 }
 0x1ee   :  { %1654 = vrot.lane.b32.xlu1 %v5179_v45, %s4984_s2 }
 0x21e   :  { %v445_v48 = vpop.permute.xlu0 %444 }
 0x220   :  { %v1049_v51 = vpop.permute.xlu1 %1048 }
 0x221   :  { %v1072_v57 = vcombine.low %v5105_v22, %v1049_v51  ;;  %v1073_v58 = vcombine.high %v5105_v22, %v1049_v51 }
 0x222   :  { %v1037_v53 = vpop.permute.xlu0 %1036 }
 0x223   :  { %v1080_v2 = vrot.slane %v1072_v57, %v5196_v56  ;;  %v1087_v3 = vrot.slane %v1073_v58, %v5196_v56 }
 0x224   :  { %v5193_v55 = vpop.permute.xlu1 %446 }
 0x226   :  { %v1061_v59 = vpop.permute.xlu0 %1060 }
 0x227   :  { %v1088_v60 = vcombine.low %v1037_v53, %v1061_v59  ;;  %v1089_v61 = vcombine.high %v1037_v53, %v1061_v59 }
 0x228   :  { %v1039_v63 = vpop.permute.xlu1 %1038 }
 0x229   :  { %v1096_v4 = vrot.slane %v1088_v60, %v5196_v56  ;;  %v1103_v5 = vrot.slane %v1089_v61, %v5196_v56 }
 0x22a   :  { %v457_v8 = vpop.permute.xlu0 %456 }
 0x22b   :  { %v1104_v9 = vcombine.low %v1080_v2, %v1096_v4  ;;  %v1105_v10 = vcombine.high %v1080_v2, %v1096_v4  ;;  %v1120_v11 = vcombine.low %v1087_v3, %v1103_v5  ;;  %v1121_v12 = vcombine.high %v1087_v3, %v1103_v5 }
 0x22c   :  { %v480_v13 = vcombine.low %v5102_v19, %v457_v8  ;;  %v481_v14 = vcombine.high %v5102_v19, %v457_v8  ;;  %v1051_v0 = vpop.permute.xlu1 %1050 }
 0x22d   :  { %v1112_v6 = vrot.slane %v1104_v9, %v5201_v62  ;;  %v1119_v7 = vrot.slane %v1105_v10, %v5201_v62  ;;  %v1128_v17 = vrot.slane %v1120_v11, %v5201_v62  ;;  %v1135_v18 = vrot.slane %v1121_v12, %v5201_v62 }
 0x22e   :  { %v469_v20 = vpop.permute.xlu0 %468  ;;  %v1140_v23 = vcombine.low %v5119_v31, %v1051_v0  ;;  %v1141_v24 = vcombine.high %v5119_v31, %v1051_v0  ;;  %v488_v34 = vrot.slane %v480_v13, %v5196_v56  ;;  %v495_v36 = vrot.slane %v481_v14, %v5196_v56 }
 0x22f   :  { %v1344_v21 = vcombine.low %v1112_v6, %v1119_v7  ;;  %v4332_v22 = vcombine.high %v1112_v6, %v1119_v7  ;;  %v496_v26 = vcombine.low %v445_v48, %v469_v20  ;;  %v497_v27 = vcombine.high %v445_v48, %v469_v20 }
 0x230   :  { %v1063_v29 = vpop.permute.xlu1 %1062  ;;  %v1360_v19 = vcombine.low %v1128_v17, %v1135_v18  ;;  %v4333_v32 = vcombine.high %v1128_v17, %v1135_v18  ;;  %v1148_v48 = vrot.slane %v1140_v23, %v5196_v56  ;;  %v1155_v50 = vrot.slane %v1141_v24, %v5196_v56 }
 0x231   :  { %v504_v38 = vrot.slane %v496_v26, %v5196_v56  ;;  %v511_v40 = vrot.slane %v497_v27, %v5196_v56  ;;  %v1156_v44 = vcombine.low %v1039_v63, %v1063_v29  ;;  %v1157_v46 = vcombine.high %v1039_v63, %v1063_v29 }
 0x232   :  { %v5219_v47 = vpop.permute.xlu0 %448  ;;  %v5222_v49 = vrot.slane %v1344_v21, %v5196_v56  ;;  %v5225_v31 = vrot.slane %v4332_v22, %v5196_v56  ;;  %v5230_v58 = vrot.slane %v1360_v19, %v5196_v56  ;;  %v5233_v59 = vrot.slane %v4333_v32, %v5196_v56 }
 0x233   :  { %v512_v51 = vcombine.low %v488_v34, %v504_v38  ;;  %v513_v52 = vcombine.high %v488_v34, %v504_v38  ;;  %v528_v53 = vcombine.low %v495_v36, %v511_v40  ;;  %v529_v54 = vcombine.high %v495_v36, %v511_v40 }
 0x234   :  { %v459_v57 = vpop.permute.xlu1 %458  ;;  %v1164_v60 = vrot.slane %v1156_v44, %v5196_v56  ;;  %v1171_v61 = vrot.slane %v1157_v46, %v5196_v56  ;;  %v1376_v36 = vcombine.low %v5222_v49, %v5225_v31  ;;  %v1392_v38 = vcombine.low %v5230_v58, %v5233_v59 }
 0x235   :  { %v520_v63 = vrot.slane %v512_v51, %v5201_v62  ;;  %v527_v2 = vrot.slane %v513_v52, %v5201_v62  ;;  %v536_v3 = vrot.slane %v528_v53, %v5201_v62  ;;  %v543_v4 = vrot.slane %v529_v54, %v5201_v62 }
 0x236   :  { %v1041_v5 = vpop.permute.xlu0 %1040  ;;  %v1172_v8 = vcombine.low %v1148_v48, %v1164_v60  ;;  %v1173_v9 = vcombine.high %v1148_v48, %v1164_v60  ;;  %v1188_v10 = vcombine.low %v1155_v50, %v1171_v61  ;;  %v1189_v11 = vcombine.high %v1155_v50, %v1171_v61 }
 0x237   :  { %v752_v12 = vcombine.low %v520_v63, %v527_v2  ;;  %v4324_v13 = vcombine.high %v520_v63, %v527_v2  ;;  %v768_v14 = vcombine.low %v536_v3, %v543_v4  ;;  %v4325_v0 = vcombine.high %v536_v3, %v543_v4 }
 0x238   :  { %v471_v6 = vpop.permute.xlu1 %470  ;;  %v1180_v7 = vrot.slane %v1172_v8, %v5201_v62  ;;  %v1187_v17 = vrot.slane %v1173_v9, %v5201_v62  ;;  %v5244_v18 = vrot.slane %v1188_v10, %v5201_v62  ;;  %v5247_v20 = vrot.slane %v1189_v11, %v5201_v62 }
 0x239   :  { %v5250_v21 = vrot.slane %v752_v12, %v5196_v56  ;;  %v5253_v22 = vrot.slane %v4324_v13, %v5196_v56  ;;  %v5256_v23 = vrot.slane %v768_v14, %v5196_v56  ;;  %v5259_v24 = vrot.slane %v4325_v0, %v5196_v56 }
 0x23a   :  { %v1053_v26 = vpop.permute.xlu0 %1052  ;;  %v1412_v27 = vcombine.low %v1180_v7, %v1187_v17  ;;  %v4334_v29 = vcombine.high %v1180_v7, %v1187_v17  ;;  %v1428_v19 = vcombine.low %v5244_v18, %v5247_v20  ;;  %v548_v32 = vcombine.low %v5111_v25, %v459_v57 }
 0x23b   :  { %v1377_v40 = vcombine.high %v5222_v49, %v5225_v31  ;;  %v784_v44 = vcombine.low %v5250_v21, %v5253_v22  ;;  %v4335_v46 = vcombine.high %v5244_v18, %v5247_v20  ;;  %v549_v48 = vcombine.high %v5111_v25, %v459_v57 }
 0x23c   :  { %v5264_v34 = vpop.permute.xlu1 %450  ;;  %v1393_v50 = vcombine.high %v5230_v58, %v5233_v59  ;;  %v785_v51 = vcombine.high %v5250_v21, %v5253_v22  ;;  %v800_v52 = vcombine.low %v5256_v23, %v5259_v24  ;;  %v801_v53 = vcombine.high %v5256_v23, %v5259_v24 }
 0x23d   :  { %v5286_v54 = vrot.slane %v1412_v27, %v5196_v56  ;;  %v5289_v61 = vrot.slane %v4334_v29, %v5196_v56  ;;  %v5292_v25 = vrot.slane %v1428_v19, %v5196_v56  ;;  %v564_v57 = vcombine.low %v5193_v55, %v471_v6 }
 0x23e   :  { %v1065_v60 = vpop.permute.xlu0 %1064  ;;  %v565_v63 = vcombine.high %v5193_v55, %v471_v6  ;;  %v556_v2 = vrot.slane %v548_v32, %v5196_v56  ;;  %v1208_v3 = vcombine.low %v5139_v37, %v1053_v26  ;;  %v1209_v4 = vcombine.high %v5139_v37, %v1053_v26 }
 0x23f   :  { %v1224_v8 = vcombine.low %v1041_v5, %v1065_v60  ;;  %v563_v10 = vrot.slane %v549_v48, %v5196_v56  ;;  %v572_v11 = vrot.slane %v564_v57, %v5196_v56  ;;  %v1225_v13 = vcombine.high %v1041_v5, %v1065_v60 }
 0x240   :  { %v5299_v9 = vpop.permute.xlu1 %1042  ;;  %v579_v12 = vrot.slane %v565_v63, %v5196_v56  ;;  %v5305_v14 = vrot.slane %v784_v44, %v5201_v62  ;;  %v5308_v55 = vrot.slane %v800_v52, %v5201_v62  ;;  %v1216_v0 = vrot.slane %v1208_v3, %v5196_v56 }
 0x241   :  { %v1232_v37 = vrot.slane %v1224_v8, %v5196_v56  ;;  %v580_v6 = vcombine.low %v556_v2, %v572_v11  ;;  %v581_v7 = vcombine.high %v556_v2, %v572_v11  ;;  %v1223_v20 = vrot.slane %v1209_v4, %v5196_v56 }
 0x242   :  { %v596_v17 = vcombine.low %v563_v10, %v579_v12  ;;  %v597_v18 = vcombine.high %v563_v10, %v579_v12  ;;  %v1239_v21 = vrot.slane %v1225_v13, %v5196_v56  ;;  %v461_v19 = vpop.permute.xlu0 %460  ;;  %v1443_v3 = vrot.slane %v4335_v46, %v5196_v56 }
 0x243   :  { %v1240_v22 = vcombine.low %v1216_v0, %v1232_v37  ;;  %v1241_v5 = vcombine.high %v1216_v0, %v1232_v37  ;;  %v588_v24 = vrot.slane %v580_v6, %v5201_v62  ;;  %v595_v26 = vrot.slane %v581_v7, %v5201_v62 }
 0x244   :  { %v1055_v23 = vpop.permute.xlu1 %1054  ;;  %v604_v27 = vrot.slane %v596_v17, %v5201_v62  ;;  %v611_v29 = vrot.slane %v597_v18, %v5201_v62  ;;  %v1256_v48 = vcombine.low %v1223_v20, %v1239_v21  ;;  %v1257_v52 = vcombine.high %v1223_v20, %v1239_v21 }
 0x245   :  { %v5319_v32 = vrot.slane %v1240_v22, %v5201_v62  ;;  %v5322_v44 = vrot.slane %v1241_v5, %v5201_v62  ;;  %v820_v60 = vcombine.low %v588_v24, %v595_v26  ;;  %v4326_v57 = vcombine.high %v588_v24, %v595_v26 }
 0x246   :  { %v836_v63 = vcombine.low %v604_v27, %v611_v29  ;;  %v4327_v2 = vcombine.high %v604_v27, %v611_v29  ;;  %v5326_v4 = vrot.slane %v1256_v48, %v5201_v62  ;;  %v5329_v8 = vrot.slane %v1257_v52, %v5201_v62 }
 0x247   :  { %v616_v10 = vcombine.low %v5133_v35, %v461_v19  ;;  %v5335_v12 = vrot.slane %v820_v60, %v5196_v56  ;;  %v5338_v13 = vrot.slane %v4326_v57, %v5196_v56  ;;  %v5347_v37 = vrot.slane %v785_v51, %v5201_v62 }
 0x248   :  { %v5332_v11 = vpop.permute.xlu1 %1066  ;;  %v5341_v0 = vrot.slane %v836_v63, %v5196_v56  ;;  %v5344_v46 = vrot.slane %v4327_v2, %v5196_v56  ;;  %v5350_v6 = vrot.slane %v801_v53, %v5201_v62  ;;  %v816_v7 = vcombine.low %v5305_v14, %v5308_v55  ;;  %v473_v53 = vpop.permute.xlu0 %472 }
 0x249   :  { %v5358_v17 = vrot.slane %v1376_v36, %v5201_v62  ;;  %v852_v18 = vcombine.low %v5335_v12, %v5338_v13  ;;  %v1480_v51 = vcombine.low %v5319_v32, %v5322_v44  ;;  %v5370_v21 = vrot.slane %v1392_v38, %v5201_v62 }
 0x24a   :  { %v868_v20 = vcombine.low %v5341_v0, %v5344_v46  ;;  %v4336_v36 = vcombine.high %v5319_v32, %v5322_v44  ;;  %v1496_v22 = vcombine.low %v5326_v4, %v5329_v8  ;;  %v4337_v5 = vcombine.high %v5326_v4, %v5329_v8 }
 0x24b   :  { %v617_v24 = vcombine.high %v5133_v35, %v461_v19  ;;  %v853_v26 = vcombine.high %v5335_v12, %v5338_v13  ;;  %v5382_v27 = vrot.slane %v852_v18, %v5201_v62  ;;  %v869_v38 = vcombine.high %v5341_v0, %v5344_v46 }
 0x24c   :  { %v624_v29 = vrot.slane %v616_v10, %v5196_v56  ;;  %v5387_v48 = vpop.permute.xlu1 %462  ;;  %v5390_v52 = vrot.slane %v868_v20, %v5201_v62  ;;  %v1276_v60 = vcombine.low %v5153_v41, %v1055_v23  ;;  %v1277_v35 = vcombine.high %v5153_v41, %v1055_v23 }
 0x24d   :  { %v632_v19 = vcombine.low %v5219_v47, %v473_v53  ;;  %v631_v57 = vrot.slane %v617_v24, %v5196_v56  ;;  %v633_v63 = vcombine.high %v5219_v47, %v473_v53  ;;  %v1408_v2 = vcombine.low %v5358_v17, %v5370_v21 }
 0x24e   :  { %v1444_v10 = vcombine.low %v5286_v54, %v5289_v61  ;;  %v1284_v12 = vrot.slane %v1276_v60, %v5196_v56  ;;  %v5403_v13 = vrot.slane %v1277_v35, %v5196_v56  ;;  %v1460_v41 = vcombine.low %v5292_v25, %v1443_v3 }
 0x24f   :  { %v640_v0 = vrot.slane %v632_v19, %v5196_v56  ;;  %v647_v23 = vrot.slane %v633_v63, %v5196_v56  ;;  %v5415_v47 = vrot.slane %v1377_v40, %v5201_v62  ;;  %v5421_v18 = vrot.slane %v1393_v50, %v5201_v62 }
 0x250   :  { %v5409_v46 = vrot.slane %v1444_v10, %v5201_v62  ;;  %v5424_v24 = vrot.slane %v1460_v41, %v5201_v62  ;;  %v1445_v60 = vcombine.high %v5286_v54, %v5289_v61  ;;  %v1461_v31 = vcombine.high %v5292_v25, %v1443_v3  ;;  %v5431_v40 = vpop.permute.xlu1 %474 }
 0x251   :  { %v648_v20 = vcombine.low %v624_v29, %v640_v0  ;;  %v649_v53 = vcombine.high %v624_v29, %v640_v0  ;;  %v664_v35 = vcombine.low %v631_v57, %v647_v23  ;;  %v665_v19 = vcombine.high %v631_v57, %v647_v23 }
 0x252   :  { %v1410_v49 = vcombine.low %v5415_v47, %v5421_v18  ;;  %v1476_v50 = vcombine.low %v5409_v46, %v5424_v24  ;;  %v5438_v29 = vrot.slane %v1445_v60, %v5201_v62  ;;  %v5443_v57 = vrot.slane %v1461_v31, %v5201_v62  ;;  %v1629_v31 = vpop.permute.xlu0 %1628 }
 0x253   :  { %v656_v58 = vrot.slane %v648_v20, %v5201_v62  ;;  %v663_v59 = vrot.slane %v649_v53, %v5201_v62  ;;  %v672_v54 = vrot.slane %v664_v35, %v5201_v62  ;;  %v679_v61 = vrot.slane %v665_v19, %v5201_v62 }
 0x254   :  { %v1292_v25 = vcombine.low %v5299_v9, %v5332_v11  ;;  %v1616_v10 = vpack.c.bf16 %v1476_v50, %v1408_v2  ;;  %v1293_v0 = vcombine.high %v5299_v9, %v5332_v11  ;;  %v1478_v20 = vcombine.low %v5438_v29, %v5443_v57  ;;  %v5466_v50 = vpop.permute.xlu1 %1630 }
 0x255   :  { %v888_v3 = vcombine.low %v656_v58, %v663_v59  ;;  %v4328_v63 = vcombine.high %v656_v58, %v663_v59  ;;  %v904_v41 = vcombine.low %v672_v54, %v679_v61  ;;  %v4329_v23 = vcombine.high %v672_v54, %v679_v61 }
 0x256   :  { %v1300_v53 = vrot.slane %v1292_v25, %v5196_v56  ;;  %v2221_v19 = vsel %vm2216_vm1, %v1616_v10, 0  ;;  %v1307_v2 = vrot.slane %v1293_v0, %v5196_v56  ;;  %v1618_v58 = vpack.c.bf16 %v1478_v20, %v1410_v49 }
 0x257   :  { %v5453_v60 = vrot.slane %v888_v3, %v5196_v56  ;;  %v5456_v35 = vrot.slane %v4328_v63, %v5196_v56  ;;  %v5461_v9 = vrot.slane %v904_v41, %v5196_v56  ;;  %v5464_v11 = vrot.slane %v4329_v23, %v5196_v56  ;;  %4515 = vmatpush3.bf16.xpose.msra.mxu0 %v2221_v19 }
 0x258   :  { %v1308_v59 = vcombine.low %v1284_v12, %v1300_v53  ;;  %v5469_v54 = vrot.slane %v853_v26, %v5201_v62  ;;  %v5475_v61 = vrot.slane %v1480_v51, %v5196_v56  ;;  %v1309_v25 = vcombine.high %v1284_v12, %v1300_v53  ;;  %4520 = vmatprep.subr.bf16.mxu0 %v4985_v42  ;;  %v1653_v53 = vpop.permute.xlu0 %1652 }
 0x259   :  { %v1324_v3 = vcombine.low %v5403_v13, %v1307_v2  ;;  %v5480_v63 = vrot.slane %v869_v38, %v5201_v62  ;;  %v884_v49 = vcombine.low %v5382_v27, %v5390_v52  ;;  %v2315_v26 = vsel %vm2216_vm1, %v1618_v58, 0 }
 0x25a   :  { %v1316_v10 = vrot.slane %v1308_v59, %v5201_v62  ;;  %v920_v0 = vcombine.low %v5453_v60, %v5456_v35  ;;  %v936_v51 = vcombine.low %v5461_v9, %v5464_v11  ;;  %4527 = vmatpush3.bf16.xpose.msra.mxu1 %v2315_v26  ;;  %v1323_v12 = vrot.slane %v1309_v25, %v5201_v62 }
 0x25b   :  { %v1325_v41 = vcombine.high %v5403_v13, %v1307_v2  ;;  %v5496_v38 = vrot.slane %v4336_v36, %v5196_v56  ;;  %v5502_v23 = vrot.slane %v1496_v22, %v5196_v56  ;;  %v5508_v20 = vrot.slane %v4337_v5, %v5196_v56  ;;  %4538 = vmatprep.subr.bf16.mxu1 %v4985_v42  ;;  %v1641_v2 = vpop.permute.xlu1 %1640 }
 0x25c   :  { %v684_v13 = vcombine.low %v5147_v39, %v5387_v48  ;;  %v5514_v32 = vrot.slane %v1324_v3, %v5201_v62  ;;  %v1548_v36 = vcombine.low %v1316_v10, %v1323_v12  ;;  %v4338_v22 = vcombine.high %v1316_v10, %v1323_v12 }
 0x25d   :  { %v5517_v44 = vrot.slane %v1325_v41, %v5201_v62  ;;  %v685_v19 = vcombine.high %v5147_v39, %v5387_v48  ;;  %v1024_v4 = vpack.c.bf16 %v884_v49, %v816_v7  ;;  %v818_v8 = vcombine.low %v5347_v37, %v5350_v6 }
 0x25e   :  { %v886_v5 = vcombine.low %v5469_v54, %v5480_v63  ;;  %v921_v58 = vcombine.high %v5453_v60, %v5456_v35  ;;  %v5531_v59 = vrot.slane %v920_v0, %v5201_v62  ;;  %v5534_v25 = vrot.slane %v936_v51, %v5201_v62 }
 0x25f   :  { %v692_v39 = vrot.slane %v684_v13, %v5196_v56  ;;  %v5538_v7 = vrot.slane %v1548_v36, %v5196_v56  ;;  %4517 = vmatmul.mubr.msk.bf16.vlgmr.msra.gmra.mxu0 %vm2216_vm1, %v1024_v4  ;;  %v1680_v3 = vcombine.low %v1629_v31, %v1653_v53  ;;  %v1681_v49 = vcombine.high %v1629_v31, %v1653_v53 }
 0x260   :  { %v1026_v48 = vpack.c.bf16 %v886_v5, %v818_v8  ;;  %v5542_v26 = vrot.slane %v4338_v22, %v5196_v56  ;;  %v1564_v10 = vcombine.low %v5514_v32, %v5517_v44  ;;  %v1409_v0 = vcombine.high %v5358_v17, %v5370_v21  ;;  %4522 = vmatprep.mubr.msk.bf16.mxu0 %vm4986_vm0, %v4985_v42 }
 0x261   :  { %v1477_v51 = vcombine.high %v5409_v46, %v5424_v24  ;;  %v4339_v12 = vcombine.high %v5514_v32, %v5517_v44  ;;  %v699_v31 = vrot.slane %v685_v19, %v5196_v56  ;;  %v700_v41 = vcombine.low %v5264_v34, %v5431_v40 }
 0x262   :  { %4529 = vmatmul.mubr.msk.bf16.vlgmr.msra.gmra.mxu1 %vm2216_vm1, %v1026_v48  ;;  %v701_v13 = vcombine.high %v5264_v34, %v5431_v40  ;;  %v1688_v17 = vrot.slane %v1680_v3, %v5196_v56  ;;  %v1695_v21 = vrot.slane %v1681_v49, %v5196_v56  ;;  %v885_v24 = vcombine.high %v5382_v27, %v5390_v52  ;;  %v5571_v40 = vpop.permute.xlu1 %1642 }
 0x263   :  { %v1617_v46 = vpack.c.bf16 %v1477_v51, %v1409_v0  ;;  %4540 = vmatprep.mubr.msk.bf16.mxu1 %vm4986_vm0, %v4985_v42  ;;  %v708_v32 = vrot.slane %v700_v41, %v5196_v56  ;;  %v817_v36 = vcombine.high %v5305_v14, %v5308_v55  ;;  %v1664_v34 = vcombine.low %v5167_v43, %v1641_v2 }
 0x264   :  { %v715_v44 = vrot.slane %v701_v13, %v5196_v56  ;;  %v1411_v53 = vcombine.high %v5415_v47, %v5421_v18  ;;  %v1479_v27 = vcombine.high %v5438_v29, %v5443_v57  ;;  %v1665_v52 = vcombine.high %v5167_v43, %v1641_v2 }
 0x265   :  { %v2268_v22 = vsel %vm2216_vm1, %v1617_v46, 0  ;;  %v716_v19 = vcombine.low %v692_v39, %v708_v32  ;;  %v717_v4 = vcombine.high %v692_v39, %v708_v32  ;;  %v1025_v14 = vpack.c.bf16 %v885_v24, %v817_v36 }
 0x266   :  { %4521 = vmatpush3.bf16.xpose.msra.mxu0 %v2268_v22  ;;  %v732_v8 = vcombine.low %v699_v31, %v715_v44  ;;  %v733_v5 = vcombine.high %v699_v31, %v715_v44  ;;  %v1672_v55 = vrot.slane %v1664_v34, %v5196_v56  ;;  %v1679_v48 = vrot.slane %v1665_v52, %v5196_v56 }
 0x267   :  { %4532 = vmatprep.subr.bf16.mxu0 %v4985_v42  ;;  %v1732_v47 = vcombine.low %v5179_v45, %v5571_v40  ;;  %v724_v18 = vrot.slane %v716_v19, %v5201_v62  ;;  %v731_v29 = vrot.slane %v717_v4, %v5201_v62  ;;  %v1619_v2 = vpack.c.bf16 %v1479_v27, %v1411_v53 }
 0x268   :  { %v740_v43 = vrot.slane %v732_v8, %v5201_v62  ;;  %v747_v57 = vrot.slane %v733_v5, %v5201_v62  ;;  %v1696_v39 = vcombine.low %v1672_v55, %v1688_v17  ;;  %v1697_v3 = vcombine.high %v1672_v55, %v1688_v17 }
 0x269   :  { %v1712_v49 = vcombine.low %v1679_v48, %v1695_v21  ;;  %v956_v0 = vcombine.low %v724_v18, %v731_v29  ;;  %v4330_v51 = vcombine.high %v724_v18, %v731_v29  ;;  %v1713_v24 = vcombine.high %v1679_v48, %v1695_v21 }
 0x26a   :  { %v972_v31 = vcombine.low %v740_v43, %v747_v57  ;;  %v4331_v41 = vcombine.high %v740_v43, %v747_v57  ;;  %v1704_v13 = vrot.slane %v1696_v39, %v5201_v62  ;;  %v1711_v46 = vrot.slane %v1697_v3, %v5201_v62  ;;  %v1655_v43 = vpop.permute.xlu1 %1654 }
 0x26b   :  { %v1720_v32 = vrot.slane %v1712_v49, %v5201_v62  ;;  %v5592_v44 = vrot.slane %v956_v0, %v5196_v56  ;;  %v5595_v36 = vrot.slane %v4330_v51, %v5196_v56  ;;  %v2362_v22 = vsel %vm2216_vm1, %v1619_v2, 0 }
 0x26c   :  { %v5598_v17 = vrot.slane %v972_v31, %v5196_v56  ;;  %v5601_v34 = vrot.slane %v4331_v41, %v5196_v56  ;;  %v1727_v21 = vrot.slane %v1713_v24, %v5201_v62  ;;  %v1936_v53 = vcombine.low %v1704_v13, %v1711_v46 }
 0x26d   :  { %4523 = vmatmul.mubr.msk.bf16.vlgmr.msra.gmra.mxu0 %vm2216_vm1, %v1025_v14  ;;  %v4340_v27 = vcombine.high %v1704_v13, %v1711_v46  ;;  %v5607_v52 = vrot.slane %v1564_v10, %v5196_v56  ;;  %v5610_v19 = vrot.slane %v4339_v12, %v5196_v56  ;;  %v988_v4 = vcombine.low %v5592_v44, %v5595_v36 }
 0x26e   :  { %v1004_v8 = vcombine.low %v5598_v17, %v5601_v34  ;;  %4533 = vmatpush3.bf16.xpose.msra.mxu0 %v2362_v22  ;;  %v1952_v5 = vcombine.low %v1720_v32, %v1727_v21  ;;  %v4341_v14 = vcombine.high %v1720_v32, %v1727_v21  ;;  %4534 = vmatprep.mubr.msk.bf16.mxu0 %vm4986_vm0, %v4985_v42 }
 0x26f   :  { %v1733_v55 = vcombine.high %v5179_v45, %v5571_v40  ;;  %v1740_v10 = vrot.slane %v1732_v47, %v5196_v56  ;;  %v989_v12 = vcombine.high %v5592_v44, %v5595_v36  ;;  %v1005_v48 = vcombine.high %v5598_v17, %v5601_v34  ;;  %4544 = vmatprep.subr.bf16.mxu0 %v4985_v42 }
 0x270   :  { %v5626_v18 = vrot.slane %v1936_v53, %v5196_v56  ;;  %v5629_v29 = vrot.slane %v4340_v27, %v5196_v56  ;;  %v5633_v57 = vrot.slane %v988_v4, %v5201_v62  ;;  %v5636_v45 = vrot.slane %v1004_v8, %v5201_v62 }
 0x271   :  { %v5639_v40 = vrot.slane %v1952_v5, %v5196_v56  ;;  %v819_v47 = vcombine.high %v5347_v37, %v5350_v6  ;;  %v887_v2 = vcombine.high %v5469_v54, %v5480_v63  ;;  %v1512_v39 = vcombine.low %v5475_v61, %v5496_v38 }
 0x272   :  { %v1528_v3 = vcombine.low %v5502_v23, %v5508_v20  ;;  %v1580_v49 = vcombine.low %v5538_v7, %v5542_v26  ;;  %v5652_v0 = vrot.slane %v4341_v14, %v5196_v56  ;;  %v1596_v51 = vcombine.low %v5607_v52, %v5610_v19 }
 0x273   :  { %v1748_v37 = vcombine.low %v5466_v50, %v1655_v43  ;;  %v1749_v6 = vcombine.high %v5466_v50, %v1655_v43  ;;  %v1027_v54 = vpack.c.bf16 %v887_v2, %v819_v47  ;;  %v1520_v63 = vrot.slane %v1512_v39, %v5201_v62 }
 0x274   :  { %v1536_v31 = vrot.slane %v1528_v3, %v5201_v62  ;;  %v1588_v41 = vrot.slane %v1580_v49, %v5201_v62  ;;  %v1747_v13 = vrot.slane %v1733_v55, %v5196_v56  ;;  %v1604_v46 = vrot.slane %v1596_v51, %v5201_v62 }
 0x275   :  { %v1756_v24 = vrot.slane %v1748_v37, %v5196_v56  ;;  %v1763_v32 = vrot.slane %v1749_v6, %v5196_v56  ;;  %4535 = vmatmul.mubr.msk.bf16.vlgmr.msra.gmra.mxu0 %vm2216_vm1, %v1027_v54  ;;  %v952_v50 = vcombine.low %v5531_v59, %v5534_v25  ;;  %v1020_v53 = vcombine.low %v5633_v57, %v5636_v45 }
 0x276   :  { %v1544_v22 = vcombine.low %v1520_v63, %v1536_v31  ;;  %v1545_v21 = vcombine.high %v1520_v63, %v1536_v31  ;;  %v1612_v27 = vcombine.low %v1588_v41, %v1604_v46  ;;  %v1613_v4 = vcombine.high %v1588_v41, %v1604_v46  ;;  %4546 = vmatprep.mubr.msk.bf16.mxu0 %vm4986_vm0, %v4985_v42 }
 0x277   :  { %v1764_v8 = vcombine.low %v1740_v10, %v1756_v24  ;;  %v1765_v5 = vcombine.high %v1740_v10, %v1756_v24  ;;  %v1780_v14 = vcombine.low %v1747_v13, %v1763_v32  ;;  %v1781_v55 = vcombine.high %v1747_v13, %v1763_v32 }
 0x278   :  { %v953_v43 = vcombine.high %v5531_v59, %v5534_v25  ;;  %v1021_v47 = vcombine.high %v5633_v57, %v5636_v45  ;;  %v1620_v2 = vpack.c.bf16 %v1612_v27, %v1544_v22  ;;  %v1621_v39 = vpack.c.bf16 %v1613_v4, %v1545_v21 }
 0x279   :  { %v1772_v3 = vrot.slane %v1764_v8, %v5201_v62  ;;  %v1779_v49 = vrot.slane %v1765_v5, %v5201_v62  ;;  %v1788_v51 = vrot.slane %v1780_v14, %v5201_v62  ;;  %v1795_v10 = vrot.slane %v1781_v55, %v5201_v62 }
 0x27a   :  { %v1513_v37 = vcombine.high %v5475_v61, %v5496_v38  ;;  %v1529_v6 = vcombine.high %v5502_v23, %v5508_v20  ;;  %v2409_v59 = vsel %vm2216_vm1, %v1620_v2, 0  ;;  %v2456_v25 = vsel %vm2216_vm1, %v1621_v39, 0 }
 0x27b   :  { %v2004_v57 = vcombine.low %v1772_v3, %v1779_v49  ;;  %v4342_v45 = vcombine.high %v1772_v3, %v1779_v49  ;;  %4539 = vmatpush3.bf16.xpose.msra.mxu1 %v2409_v59  ;;  %4545 = vmatpush3.bf16.xpose.msra.mxu0 %v2456_v25  ;;  %v2020_v54 = vcombine.low %v1788_v51, %v1795_v10 }
 0x27c   :  { %v4343_v63 = vcombine.high %v1788_v51, %v1795_v10  ;;  %v1527_v31 = vrot.slane %v1513_v37, %v5201_v62  ;;  %4550 = vmatprep.subr.bf16.mxu1 %v4985_v42  ;;  %4556 = vmatprep.subr.bf16.mxu0 %v4985_v42  ;;  %v1543_v61 = vrot.slane %v1529_v6, %v5201_v62 }
 0x27d   :  { %v2011_v41 = vrot.slane %v2004_v57, %v5196_v56  ;;  %v2019_v13 = vrot.slane %v4342_v45, %v5196_v56  ;;  %v2027_v38 = vrot.slane %v2020_v54, %v5196_v56  ;;  %v1581_v20 = vcombine.high %v5538_v7, %v5542_v26 }
 0x27e   :  { %v2035_v23 = vrot.slane %v4343_v63, %v5196_v56  ;;  %v1597_v46 = vcombine.high %v5607_v52, %v5610_v19  ;;  %v935_v24 = vrot.slane %v921_v58, %v5201_v62  ;;  %v937_v32 = vcombine.high %v5461_v9, %v5464_v11 }
 0x27f   :  { %v1028_v22 = vpack.c.bf16 %v1020_v53, %v952_v50  ;;  %v1029_v21 = vpack.c.bf16 %v1021_v47, %v953_v43  ;;  %v1003_v27 = vrot.slane %v989_v12, %v5201_v62  ;;  %v1019_v7 = vrot.slane %v1005_v48, %v5201_v62 }
 0x280   :  { %v1595_v26 = vrot.slane %v1581_v20, %v5201_v62  ;;  %v1611_v60 = vrot.slane %v1597_v46, %v5201_v62  ;;  %v1546_v35 = vcombine.low %v1527_v31, %v1543_v61  ;;  %v1968_v9 = vcombine.low %v5626_v18, %v5629_v29 }
 0x281   :  { %v1984_v11 = vcombine.low %v5639_v40, %v5652_v0  ;;  %v2036_v58 = vcombine.low %v2011_v41, %v2019_v13  ;;  %v1547_v44 = vcombine.high %v1527_v31, %v1543_v61  ;;  %v2052_v19 = vcombine.low %v2027_v38, %v2035_v23 }
 0x282   :  { %v1614_v52 = vcombine.low %v1595_v26, %v1611_v60  ;;  %v1615_v36 = vcombine.high %v1595_v26, %v1611_v60  ;;  %4541 = vmatmul.mubr.msk.bf16.vlgmr.msra.gmra.mxu1 %vm2216_vm1, %v1028_v22  ;;  %4547 = vmatmul.mubr.msk.bf16.vlgmr.msra.gmra.mxu0 %vm2216_vm1, %v1029_v21  ;;  %v1976_v17 = vrot.slane %v1968_v9, %v5201_v62 }
 0x283   :  { %v1992_v34 = vrot.slane %v1984_v11, %v5201_v62  ;;  %v2044_v12 = vrot.slane %v2036_v58, %v5201_v62  ;;  %4552 = vmatprep.mubr.msk.bf16.mxu1 %vm4986_vm0, %v4985_v42  ;;  %4558 = vmatprep.mubr.msk.bf16.mxu0 %vm4986_vm0, %v4985_v42  ;;  %v2060_v53 = vrot.slane %v2052_v19, %v5201_v62 }
 0x284   :  { %v1622_v48 = vpack.c.bf16 %v1614_v52, %v1546_v35  ;;  %v1623_v50 = vpack.c.bf16 %v1615_v36, %v1547_v44  ;;  %v951_v4 = vrot.slane %v937_v32, %v5201_v62  ;;  %v1022_v8 = vcombine.low %v1003_v27, %v1019_v7 }
 0x285   :  { %v1969_v5 = vcombine.high %v5626_v18, %v5629_v29  ;;  %v1985_v14 = vcombine.high %v5639_v40, %v5652_v0  ;;  %v2068_v47 = vcombine.low %v2044_v12, %v2060_v53  ;;  %v2069_v2 = vcombine.high %v2044_v12, %v2060_v53 }
 0x286   :  { %v2503_v55 = vsel %vm2216_vm1, %v1622_v48, 0  ;;  %v2550_v43 = vsel %vm2216_vm1, %v1623_v50, 0  ;;  %v2037_v49 = vcombine.high %v2011_v41, %v2019_v13  ;;  %v1023_v51 = vcombine.high %v1003_v27, %v1019_v7 }
 0x287   :  { %4551 = vmatpush3.bf16.xpose.msra.mxu1 %v2503_v55  ;;  %4557 = vmatpush3.bf16.xpose.msra.mxu0 %v2550_v43  ;;  %v1983_v39 = vrot.slane %v1969_v5, %v5201_v62  ;;  %v1999_v3 = vrot.slane %v1985_v14, %v5201_v62  ;;  %v2000_v18 = vcombine.low %v1976_v17, %v1992_v34 }
 0x288   :  { %4562 = vmatprep.subr.bf16.mxu1 %v4985_v42  ;;  %4568 = vmatprep.subr.bf16.mxu0 %v4985_v42  ;;  %v2053_v29 = vcombine.high %v2027_v38, %v2035_v23  ;;  %v2001_v40 = vcombine.high %v1976_v17, %v1992_v34  ;;  %v2051_v10 = vrot.slane %v2037_v49, %v5201_v62 }
 0x289   :  { %v2002_v0 = vcombine.low %v1983_v39, %v1999_v3  ;;  %v2003_v37 = vcombine.high %v1983_v39, %v1999_v3  ;;  %v954_v6 = vcombine.low %v935_v24, %v951_v4  ;;  %v955_v59 = vcombine.high %v935_v24, %v951_v4 }
 0x28a   :  { %v2067_v25 = vrot.slane %v2053_v29, %v5201_v62  ;;  %v2208_v57 = vpack.c.bf16 %v2068_v47, %v2000_v18  ;;  %v2209_v45 = vpack.c.bf16 %v2069_v2, %v2001_v40 }
 0x28b   :  { %v1030_v54 = vpack.c.bf16 %v1022_v8, %v954_v6  ;;  %v1031_v63 = vpack.c.bf16 %v1023_v51, %v955_v59 }
 0x28c   :  { %v2070_v31 = vcombine.low %v2051_v10, %v2067_v25  ;;  %v2071_v41 = vcombine.high %v2051_v10, %v2067_v25 }
 0x28e   :  { %4553 = vmatmul.mubr.msk.bf16.vlgmr.msra.gmra.mxu1 %vm2216_vm1, %v1030_v54  ;;  %4559 = vmatmul.mubr.msk.bf16.vlgmr.msra.gmra.mxu0 %vm2216_vm1, %v1031_v63  ;;  %v5743_v13 = vpack.c.bf16 %v2070_v31, %v2002_v0  ;;  %v5745_v61 = vpack.c.bf16 %v2071_v41, %v2003_v37 }
 0x28f   :  { %4563 = vmatpush3.bf16.msra.mxu1 %v2208_v57  ;;  %4569 = vmatpush3.bf16.msra.mxu0 %v2209_v45 }
 0x290   :  { %4564 = vmatprep.mubr.msk.bf16.mxu1 %vm4986_vm0, %v4985_v42  ;;  %4574 = vmatprep.subr.bf16.mxu1 %v4985_v42 }
 0x291   :  { %4570 = vmatprep.mubr.msk.bf16.mxu0 %vm4986_vm0, %v4985_v42  ;;  %4580 = vmatprep.subr.bf16.mxu0 %v4985_v42 }
 0x31f   :  { %v5753_v38 = vpop.f32.mrf.mxu0 }
 0x320   :  { %v2594_v23 = vsel %vm2593_vm2, %v5753_v38, -inf }
 0x321   :  { %2595 = vmax.xlane.f32.xlu0 %v2594_v23  ;;  %v4518_v46 = vpop.f32.mrf.mxu0 }
 0x322   :  { %v5757_v20 = vpop.f32.mrf.mxu1 }
 0x323   :  { %v5759_v32 = vpop.f32.mrf.mxu0  ;;  %v2606_v22 = vsel %vm2593_vm2, %v5757_v20, -inf }
 0x324   :  { %v4530_v24 = vpop.f32.mrf.mxu1  ;;  %v2597_v21 = vsel %vm2593_vm2, %v5759_v32, -inf }
 0x325   :  { %2607 = vmax.xlane.f32.xlu0 %v2606_v22  ;;  %2598 = vmax.xlane.f32.xlu1 %v2597_v21  ;;  %v4519_v7 = vpop.f32.mrf.mxu0 }
 0x326   :  { %v5765_v27 = vpop.f32.mrf.mxu1 }
 0x327   :  { %v2609_v60 = vsel %vm2593_vm2, %v5765_v27, -inf }
 0x328   :  { %v4531_v26 = vpop.f32.mrf.mxu1 }
 0x329   :  { %2610 = vmax.xlane.f32.xlu1 %v2609_v60 }
 0x32d   :  { %v5769_v35 = vpop.f32.mrf.mxu0 }
 0x32e   :  { %v2600_v9 = vsel %vm2593_vm2, %v5769_v35, -inf }
 0x32f   :  { %2601 = vmax.xlane.f32.xlu0 %v2600_v9  ;;  %v4524_v11 = vpop.f32.mrf.mxu0 }
 0x331   :  { %v5773_v58 = vpop.f32.mrf.mxu0 }
 0x332   :  { %v2603_v5 = vsel %vm2593_vm2, %v5773_v58, -inf }
 0x333   :  { %v4525_v52 = vpop.f32.mrf.mxu0 }
 0x335   :  { %v5775_v44 = vpop.f32.mrf.mxu0 }
 0x336   :  { %v2612_v47 = vsel %vm2593_vm2, %v5775_v44, -inf }
 0x337   :  { %v4536_v36 = vpop.f32.mrf.mxu0 }
 0x339   :  { %v5777_v19 = vpop.f32.mrf.mxu0 }
 0x33a   :  { %v2615_v2 = vsel %vm2593_vm2, %v5777_v19, -inf }
 0x33b   :  { %v4537_v17 = vpop.f32.mrf.mxu0 }
 0x342   :  { %v5779_v34 = vpop.f32.mrf.mxu1  ;;  %v5781_v12 = vpop.f32.mrf.mxu0 }
 0x343   :  { %v2618_v48 = vsel %vm2593_vm2, %v5779_v34, -inf  ;;  %v2624_v6 = vsel %vm2593_vm2, %v5781_v12, -inf }
 0x344   :  { %v4548_v50 = vpop.f32.mrf.mxu0  ;;  %2619 = vmax.xlane.f32.xlu0 %v2618_v48  ;;  %v4542_v53 = vpop.f32.mrf.mxu1 }
 0x346   :  { %v5785_v4 = vpop.f32.mrf.mxu1  ;;  %v5787_v8 = vpop.f32.mrf.mxu0 }
 0x347   :  { %v2621_v14 = vsel %vm2593_vm2, %v5785_v4, -inf  ;;  %v2627_v25 = vsel %vm2593_vm2, %v5787_v8, -inf }
 0x348   :  { %v4549_v55 = vpop.f32.mrf.mxu0  ;;  %2604 = vmax.xlane.f32.xlu0 %v2603_v5  ;;  %2622 = vmax.xlane.f32.xlu1 %v2621_v14  ;;  %v4543_v43 = vpop.f32.mrf.mxu1 }
 0x34c   :  { %2613 = vmax.xlane.f32.xlu0 %v2612_v47  ;;  %2616 = vmax.xlane.f32.xlu1 %v2615_v2 }
 0x34e   :  { %v5797_v39 = vpop.f32.mrf.mxu1  ;;  %v5799_v3 = vpop.f32.mrf.mxu0 }
 0x34f   :  { %v2630_v18 = vsel %vm2593_vm2, %v5797_v39, -inf  ;;  %v2636_v59 = vsel %vm2593_vm2, %v5799_v3, -inf }
 0x350   :  { %v4560_v49 = vpop.f32.mrf.mxu0  ;;  %v4554_v51 = vpop.f32.mrf.mxu1  ;;  %2631 = vmax.xlane.f32.xlu0 %v2630_v18 }
 0x352   :  { %v5803_v29 = vpop.f32.mrf.mxu1  ;;  %v5805_v40 = vpop.f32.mrf.mxu0 }
 0x353   :  { %v2633_v0 = vsel %vm2593_vm2, %v5803_v29, -inf  ;;  %v2639_v57 = vsel %vm2593_vm2, %v5805_v40, -inf }
 0x354   :  { %v4561_v10 = vpop.f32.mrf.mxu0  ;;  %2634 = vmax.xlane.f32.xlu1 %v2633_v0  ;;  %v4555_v37 = vpop.f32.mrf.mxu1  ;;  %2625 = vmax.xlane.f32.xlu0 %v2624_v6 }
 0x365   :  { %1634 = vrot.lane.b32.xlu1 %v5123_v33, %s4983_s16 }
 0x369   :  { %1644 = vrot.lane.b32.xlu1 %v5115_v28, %s4979_s5 }
 0x36a   :  { %1632 = vrot.lane.b32.xlu0 %v5115_v28, %s4983_s16 }
 0x389   :  { %2637 = vmax.xlane.f32.xlu0 %v2636_v59 }
 0x38d   :  { %2628 = vmax.xlane.f32.xlu1 %v2627_v25 }
 0x391   :  { %2640 = vmax.xlane.f32.xlu1 %v2639_v57 }
 0x39f   :  { %1656 = vrot.lane.b32.xlu0 %v5115_v28, %s4984_s2 }
 0x3a2   :  { %1646 = vrot.lane.b32.xlu1 %v5123_v33, %s4979_s5 }
 0x3aa   :  { %v2596_v45 = vpop.xlane.xlu0 %2595 }
 0x3ab   :  { %v2642_v54 = vsub.f32 %v5753_v38, %v2596_v45 }
 0x3ad   :  { %v2658_v63 = vmul.f32 1.442695, %v2642_v54 }
 0x3ae   :  { %v2608_v31 = vpop.xlane.xlu0 %2607  ;;  %v2599_v41 = vpop.xlane.xlu1 %2598 }
 0x3af   :  { %4767 = vpow2.f32 %v2658_v63  ;;  %v2646_v23 = vsub.f32 %v5757_v20, %v2608_v31  ;;  %v2643_v46 = vsub.f32 %v5759_v32, %v2599_v41 }
 0x3b1   :  { %v2666_v24 = vmul.f32 1.442695, %v2646_v23  ;;  %v2660_v22 = vmul.f32 1.442695, %v2643_v46 }
 0x3b2   :  { %v2611_v21 = vpop.xlane.xlu1 %2610 }
 0x3b3   :  { %4769 = vpow2.f32 %v2666_v24  ;;  %v2647_v7 = vsub.f32 %v5765_v27, %v2611_v21 }
 0x3b4   :  { %4771 = vpow2.f32 %v2660_v22 }
 0x3b5   :  { %v2668_v26 = vmul.f32 1.442695, %v2647_v7 }
 0x3b7   :  { %4773 = vpow2.f32 %v2668_v26 }
 0x3b8   :  { %v2602_v60 = vpop.xlane.xlu0 %2601 }
 0x3b9   :  { %v2644_v38 = vsub.f32 %v5769_v35, %v2602_v60 }
 0x3bb   :  { %v2662_v9 = vmul.f32 1.442695, %v2644_v38 }
 0x3bc   :  { %v5832_v11 = vpop.eup %4767 }
 0x3bd   :  { %4775 = vpow2.f32 %v2662_v9  ;;  %v2690_v20 = vsel %vm2593_vm2, %v5832_v11, 0.0 }
 0x3be   :  { %2691 = vadd.xlane.f32.xlu0 %v2690_v20 }
 0x3c0   :  { %v5836_v32 = vpop.eup %4769 }
 0x3c1   :  { %v5838_v52 = vpop.eup %4771  ;;  %v2702_v27 = vsel %vm2593_vm2, %v5836_v32, 0.0 }
 0x3c2   :  { %2703 = vadd.xlane.f32.xlu0 %v2702_v27  ;;  %v2693_v36 = vsel %vm2593_vm2, %v5838_v52, 0.0 }
 0x3c4   :  { %v5844_v35 = vpop.eup %4773 }
 0x3c5   :  { %v2705_v17 = vsel %vm2593_vm2, %v5844_v35, 0.0 }
 0x3c6   :  { %2694 = vadd.xlane.f32.xlu1 %v2693_v36 }
 0x3ca   :  { %v5848_v48 = vpop.eup %4775  ;;  %2706 = vadd.xlane.f32.xlu1 %v2705_v17 }
 0x3cb   :  { %v2696_v50 = vsel %vm2593_vm2, %v5848_v48, 0.0 }
 0x3cc   :  { %2697 = vadd.xlane.f32.xlu0 %v2696_v50 }
 0x3cd   :  { %v2620_v53 = vpop.xlane.xlu0 %2619 }
 0x3ce   :  { %v2650_v5 = vsub.f32 %v5779_v34, %v2620_v53 }
 0x3d0   :  { %v2674_v14 = vmul.f32 1.442695, %v2650_v5 }
 0x3d1   :  { %v2605_v55 = vpop.xlane.xlu0 %2604  ;;  %v2623_v43 = vpop.xlane.xlu1 %2622 }
 0x3d2   :  { %4777 = vpow2.f32 %v2674_v14  ;;  %v2645_v47 = vsub.f32 %v5773_v58, %v2605_v55  ;;  %v2651_v2 = vsub.f32 %v5785_v4, %v2623_v43 }
 0x3d4   :  { %v2664_v49 = vmul.f32 1.442695, %v2645_v47  ;;  %v2676_v51 = vmul.f32 1.442695, %v2651_v2 }
 0x3d5   :  { %v2614_v18 = vpop.xlane.xlu0 %2613  ;;  %v2617_v0 = vpop.xlane.xlu1 %2616 }
 0x3d6   :  { %4779 = vpow2.f32 %v2664_v49  ;;  %v2648_v10 = vsub.f32 %v5775_v44, %v2614_v18  ;;  %v2649_v37 = vsub.f32 %v5777_v19, %v2617_v0 }
 0x3d7   :  { %4781 = vpow2.f32 %v2676_v51 }
 0x3d8   :  { %v2670_v6 = vmul.f32 1.442695, %v2648_v10  ;;  %v2672_v34 = vmul.f32 1.442695, %v2649_v37 }
 0x3d9   :  { %v2632_v59 = vpop.xlane.xlu0 %2631 }
 0x3da   :  { %4783 = vpow2.f32 %v2670_v6  ;;  %v2654_v25 = vsub.f32 %v5797_v39, %v2632_v59 }
 0x3db   :  { %4785 = vpow2.f32 %v2672_v34 }
 0x3dc   :  { %v2682_v45 = vmul.f32 1.442695, %v2654_v25 }
 0x3dd   :  { %v2626_v58 = vpop.xlane.xlu0 %2625  ;;  %v5887_v26 = vpop.xlane.xlu1 %2634 }
 0x3de   :  { %v2652_v4 = vsub.f32 %v5781_v12, %v2626_v58 }
 0x3df   :  { %v5859_v57 = vpop.eup %4777 }
 0x3e0   :  { %v2678_v54 = vmul.f32 1.442695, %v2652_v4  ;;  %v2714_v44 = vsel %vm2593_vm2, %v5859_v57, 0.0 }
 0x3e1   :  { %2715 = vadd.xlane.f32.xlu0 %v2714_v44  ;;  %v5889_v60 = vpop.permute.xlu1 %1634  ;;  %v1633_v38 = vpop.permute.xlu0 %1632 }
 0x3e2   :  { %4787 = vpow2.f32 %v2678_v54 }
 0x3e3   :  { %v5863_v19 = vpop.eup %4779  ;;  %4789 = vpow2.f32 %v2682_v45 }
 0x3e4   :  { %v2699_v63 = vsel %vm2593_vm2, %v5863_v19, 0.0  ;;  %v5867_v31 = vpop.eup %4781 }
 0x3e5   :  { %2700 = vadd.xlane.f32.xlu1 %v2699_v63  ;;  %v2717_v41 = vsel %vm2593_vm2, %v5867_v31, 0.0  ;;  %v1645_v9 = vpop.permute.xlu1 %1644 }
 0x3e6   :  { %v1800_v36 = vcombine.low %v5115_v28, %v1645_v9  ;;  %v1801_v17 = vcombine.high %v5115_v28, %v1645_v9 }
 0x3e7   :  { %v5869_v39 = vpop.eup %4783 }
 0x3e8   :  { %v2708_v12 = vsel %vm2593_vm2, %v5869_v39, 0.0  ;;  %v5875_v23 = vpop.eup %4785  ;;  %v1808_v2 = vrot.slane %v1800_v36, %v5196_v56  ;;  %v1815_v49 = vrot.slane %v1801_v17, %v5196_v56 }
 0x3e9   :  { %2709 = vadd.xlane.f32.xlu0 %v2708_v12  ;;  %2718 = vadd.xlane.f32.xlu1 %v2717_v41  ;;  %v2711_v46 = vsel %vm2593_vm2, %v5875_v23, 0.0 }
 0x3ed   :  { %2712 = vadd.xlane.f32.xlu0 %v2711_v46 }
 0x3ef   :  { %v5879_v24 = vpop.eup %4787 }
 0x3f0   :  { %v2720_v22 = vsel %vm2593_vm2, %v5879_v24, 0.0  ;;  %v5883_v21 = vpop.eup %4789 }
 0x3f1   :  { %2721 = vadd.xlane.f32.xlu0 %v2720_v22  ;;  %v2726_v7 = vsel %vm2593_vm2, %v5883_v21, 0.0 }
 0x3f5   :  { %2727 = vadd.xlane.f32.xlu0 %v2726_v7 }
 0x412   :  { %v2638_v20 = vpop.xlane.xlu0 %2637 }
 0x413   :  { %v2656_v27 = vsub.f32 %v5799_v3, %v2638_v20 }
 0x415   :  { %v2686_v50 = vmul.f32 1.442695, %v2656_v27 }
 0x416   :  { %v2629_v53 = vpop.xlane.xlu1 %2628  ;;  %v1657_v14 = vpop.permute.xlu0 %1656 }
 0x417   :  { %v2653_v5 = vsub.f32 %v5787_v8, %v2629_v53  ;;  %4791 = vpow2.f32 %v2686_v50  ;;  %v1816_v55 = vcombine.low %v1633_v38, %v1657_v14  ;;  %v1817_v43 = vcombine.high %v1633_v38, %v1657_v14 }
 0x419   :  { %v2680_v47 = vmul.f32 1.442695, %v2653_v5  ;;  %v1824_v51 = vrot.slane %v1816_v55, %v5196_v56  ;;  %v1831_v3 = vrot.slane %v1817_v43, %v5196_v56 }
 0x41a   :  { %v2641_v18 = vpop.xlane.xlu1 %2640 }
 0x41b   :  { %4793 = vpow2.f32 %v2680_v47  ;;  %v2657_v28 = vsub.f32 %v5805_v40, %v2641_v18  ;;  %v1832_v0 = vcombine.low %v1808_v2, %v1824_v51  ;;  %v1833_v10 = vcombine.high %v1808_v2, %v1824_v51 }
 0x41c   :  { %v1848_v8 = vcombine.low %v1815_v49, %v1831_v3  ;;  %v1849_v37 = vcombine.high %v1815_v49, %v1831_v3  ;;  %v2655_v51 = vsub.f32 %v5803_v29, %v5887_v26 }
 0x41d   :  { %v2688_v6 = vmul.f32 1.442695, %v2657_v28  ;;  %v1840_v34 = vrot.slane %v1832_v0, %v5201_v62  ;;  %v1847_v59 = vrot.slane %v1833_v10, %v5201_v62 }
 0x41e   :  { %v1856_v25 = vrot.slane %v1848_v8, %v5201_v62  ;;  %v1863_v58 = vrot.slane %v1849_v37, %v5201_v62  ;;  %v2684_v3 = vmul.f32 1.442695, %v2655_v51  ;;  %v5944_v18 = vpop.permute.xlu1 %1646 }
 0x41f   :  { %4795 = vpow2.f32 %v2688_v6  ;;  %v2072_v4 = vcombine.low %v1840_v34, %v1847_v59  ;;  %v4344_v45 = vcombine.high %v1840_v34, %v1847_v59  ;;  %v1868_v51 = vcombine.low %v5123_v33, %v5944_v18 }
 0x420   :  { %v2088_v54 = vcombine.low %v1856_v25, %v1863_v58  ;;  %v4345_v44 = vcombine.high %v1856_v25, %v1863_v58  ;;  %4797 = vpow2.f32 %v2684_v3  ;;  %v1869_v3 = vcombine.high %v5123_v33, %v5944_v18 }
 0x421   :  { %v2079_v40 = vrot.slane %v2072_v4, %v5196_v56  ;;  %v2087_v63 = vrot.slane %v4344_v45, %v5196_v56 }
 0x422   :  { %v2095_v12 = vrot.slane %v2088_v54, %v5196_v56  ;;  %v2103_v41 = vrot.slane %v4345_v44, %v5196_v56 }
 0x423   :  { %v2104_v46 = vcombine.low %v2079_v40, %v2087_v63  ;;  %v2105_v7 = vcombine.high %v2079_v40, %v2087_v63 }
 0x424   :  { %v2120_v22 = vcombine.low %v2095_v12, %v2103_v41  ;;  %v2121_v38 = vcombine.high %v2095_v12, %v2103_v41  ;;  %v5908_v9 = vpop.eup %4791 }
 0x425   :  { %v2732_v20 = vsel %vm2593_vm2, %v5908_v9, 0.0  ;;  %v5913_v27 = vrot.slane %v2104_v46, %v5201_v62  ;;  %v5919_v17 = vrot.slane %v2105_v7, %v5201_v62 }
 0x426   :  { %v5916_v36 = vrot.slane %v2120_v22, %v5201_v62  ;;  %2733 = vadd.xlane.f32.xlu0 %v2732_v20  ;;  %v5922_v50 = vrot.slane %v2121_v38, %v5201_v62 }
 0x428   :  { %v5924_v53 = vpop.eup %4793  ;;  %v2136_v5 = vcombine.low %v5913_v27, %v5916_v36  ;;  %v2137_v14 = vcombine.high %v5913_v27, %v5916_v36  ;;  %v2138_v43 = vcombine.low %v5919_v17, %v5922_v50  ;;  %v2139_v47 = vcombine.high %v5919_v17, %v5922_v50 }
 0x429   :  { %v2723_v55 = vsel %vm2593_vm2, %v5924_v53, 0.0 }
 0x42a   :  { %2724 = vadd.xlane.f32.xlu1 %v2723_v55 }
 0x42c   :  { %v5936_v2 = vpop.eup %4795 }
 0x42d   :  { %v2735_v49 = vsel %vm2593_vm2, %v5936_v2, 0.0  ;;  %v5946_v37 = vpop.eup %4797 }
 0x42e   :  { %2736 = vadd.xlane.f32.xlu0 %v2735_v49  ;;  %v2729_v59 = vsel %vm2593_vm2, %v5946_v37, 0.0 }
 0x43b   :  { %1658 = vrot.lane.b32.xlu1 %v5123_v33, %s4984_s2 }
 0x447   :  { %v2692_v28 = vpop.xlane.xlu0 %2691 }
 0x448   :  { %4799 = vrcp.f32 %v2692_v28 }
 0x44b   :  { %v2704_v10 = vpop.xlane.xlu0 %2703 }
 0x44f   :  { %v2695_v0 = vpop.xlane.xlu1 %2694 }
 0x450   :  { %4801 = vrcp.f32 %v2695_v0 }
 0x453   :  { %v2707_v8 = vpop.xlane.xlu1 %2706 }
 0x454   :  { %4803 = vrcp.f32 %v2707_v8  ;;  %v1883_v8 = vrot.slane %v1869_v3, %v5196_v56 }
 0x455   :  { %4805 = vrcp.f32 %v2704_v10  ;;  %v4800_v6 = vpop.eup %4799  ;;  %v1876_v10 = vrot.slane %v1868_v51, %v5196_v56 }
 0x456   :  { %v2754_v29 = vmul.f32 %v4800_v6, %v5832_v11 }
 0x45d   :  { %v4802_v34 = vpop.eup %4801 }
 0x45e   :  { %v2755_v26 = vmul.f32 %v4802_v34, %v5838_v52  ;;  %v2698_v52 = vpop.xlane.xlu0 %2697 }
 0x45f   :  { %2730 = vadd.xlane.f32.xlu1 %v2729_v59  ;;  %4807 = vrcp.f32 %v2698_v52 }
 0x460   :  { %v2770_v25 = vpack.c.bf16 %v2755_v26, %v2754_v29 }
 0x461   :  { %v4804_v58 = vpop.eup %4803 }
 0x462   :  { %4565 = vmatmul.mubr.msk.bf16.vlgmr.msra.gmra.mxu1 %vm2593_vm2, %v2770_v25  ;;  %v4806_v4 = vpop.eup %4805  ;;  %v2759_v45 = vmul.f32 %v4804_v58, %v5844_v35 }
 0x463   :  { %4575 = vmatpush3.bf16.msra.mxu1 %v5743_v13  ;;  %4576 = vmatprep.mubr.msk.bf16.mxu1 %vm4986_vm0, %v4985_v42  ;;  %v2758_v54 = vmul.f32 %v4806_v4, %v5836_v32 }
 0x464   :  { %4586 = vmatprep.subr.bf16.mxu1 %v4985_v42 }
 0x465   :  { %v2772_v11 = vpack.c.bf16 %v2759_v45, %v2758_v54 }
 0x46a   :  { %4577 = vmatmul.mubr.msk.bf16.vlgmr.msra.gmra.mxu1 %vm2593_vm2, %v2772_v11  ;;  %v2716_v44 = vpop.xlane.xlu0 %2715 }
 0x46b   :  { %4588 = vmatprep.mubr.msk.bf16.mxu1 %vm4986_vm0, %v4985_v42 }
 0x46c   :  { %v4808_v35 = vpop.eup %4807 }
 0x46d   :  { %v2756_v41 = vmul.f32 %v4808_v35, %v5848_v48 }
 0x46e   :  { %v2701_v40 = vpop.xlane.xlu1 %2700 }
 0x46f   :  { %4809 = vrcp.f32 %v2701_v40 }
 0x472   :  { %v2710_v13 = vpop.xlane.xlu0 %2709 }
 0x473   :  { %4811 = vrcp.f32 %v2710_v13 }
 0x476   :  { %v2713_v63 = vpop.xlane.xlu0 %2712 }
 0x477   :  { %4813 = vrcp.f32 %v2713_v63 }
 0x47a   :  { %v2722_v48 = vpop.xlane.xlu0 %2721 }
 0x47c   :  { %v4810_v12 = vpop.eup %4809 }
 0x47d   :  { %v2757_v32 = vmul.f32 %v4810_v12, %v5863_v19  ;;  %v2719_v19 = vpop.xlane.xlu1 %2718 }
 0x47e   :  { %4815 = vrcp.f32 %v2719_v19 }
 0x47f   :  { %v2771_v46 = vpack.c.bf16 %v2757_v32, %v2756_v41 }
 0x480   :  { %v4812_v22 = vpop.eup %4811 }
 0x481   :  { %4571 = vmatmul.mubr.msk.bf16.vlgmr.msra.gmra.mxu0 %vm2593_vm2, %v2771_v46  ;;  %v2760_v38 = vmul.f32 %v4812_v22, %v5869_v39 }
 0x482   :  { %4581 = vmatpush3.bf16.msra.mxu0 %v5745_v61  ;;  %4582 = vmatprep.mubr.msk.bf16.mxu0 %vm4986_vm0, %v4985_v42  ;;  %v5974_v61 = vpop.xlane.xlu0 %2727 }
 0x483   :  { %4592 = vmatprep.subr.bf16.mxu0 %v4985_v42 }
 0x484   :  { %v4814_v7 = vpop.eup %4813 }
 0x485   :  { %v2761_v20 = vmul.f32 %v4814_v7, %v5875_v23 }
 0x487   :  { %v2773_v55 = vpack.c.bf16 %v2761_v20, %v2760_v38 }
 0x489   :  { %4583 = vmatmul.mubr.msk.bf16.vlgmr.msra.gmra.mxu0 %vm2593_vm2, %v2773_v55 }
 0x48a   :  { %4594 = vmatprep.mubr.msk.bf16.mxu0 %vm4986_vm0, %v4985_v42 }
 0x48b   :  { %v4816_v46 = vpop.eup %4815 }
 0x4af   :  { %v2734_v23 = vpop.xlane.xlu0 %2733 }
 0x4b3   :  { %v2725_v49 = vpop.xlane.xlu1 %2724 }
 0x4b4   :  { %4817 = vrcp.f32 %v2725_v49 }
 0x4b5   :  { %4819 = vrcp.f32 %v2716_v44 }
 0x4b6   :  { %4821 = vrcp.f32 %v2722_v48 }
 0x4b7   :  { %v1659_v39 = vpop.permute.xlu1 %1658  ;;  %v2737_v26 = vpop.xlane.xlu0 %2736 }
 0x4b8   :  { %v1884_v28 = vcombine.low %v5889_v60, %v1659_v39  ;;  %v1885_v0 = vcombine.high %v5889_v60, %v1659_v39  ;;  %4823 = vrcp.f32 %v2737_v26 }
 0x4b9   :  { %4825 = vrcp.f32 %v2734_v23  ;;  %v2763_v23 = vmul.f32 %v4816_v46, %v5867_v31 }
 0x4ba   :  { %v1892_v6 = vrot.slane %v1884_v28, %v5196_v56  ;;  %v1899_v34 = vrot.slane %v1885_v0, %v5196_v56  ;;  %4827 = vrcp.f32 %v5974_v61 }
 0x4bc   :  { %v1900_v59 = vcombine.low %v1876_v10, %v1892_v6  ;;  %v1901_v33 = vcombine.high %v1876_v10, %v1892_v6  ;;  %v1916_v18 = vcombine.low %v1883_v8, %v1899_v34  ;;  %v1917_v29 = vcombine.high %v1883_v8, %v1899_v34 }
 0x4be   :  { %v1908_v25 = vrot.slane %v1900_v59, %v5201_v62  ;;  %v1915_v60 = vrot.slane %v1901_v33, %v5201_v62  ;;  %v1924_v58 = vrot.slane %v1916_v18, %v5201_v62  ;;  %v1931_v4 = vrot.slane %v1917_v29, %v5201_v62 }
 0x4c0   :  { %v2140_v45 = vcombine.low %v1908_v25, %v1915_v60  ;;  %v4346_v54 = vcombine.high %v1908_v25, %v1915_v60  ;;  %v2156_v11 = vcombine.low %v1924_v58, %v1931_v4  ;;  %v4347_v52 = vcombine.high %v1924_v58, %v1931_v4 }
 0x4c1   :  { %v4818_v22 = vpop.eup %4817 }
 0x4c2   :  { %v2147_v44 = vrot.slane %v2140_v45, %v5196_v56  ;;  %v2155_v40 = vrot.slane %v4346_v54, %v5196_v56  ;;  %v2163_v13 = vrot.slane %v2156_v11, %v5196_v56  ;;  %v2171_v63 = vrot.slane %v4347_v52, %v5196_v56  ;;  %v4820_v48 = vpop.eup %4819 }
 0x4c3   :  { %v4822_v19 = vpop.eup %4821  ;;  %v2765_v28 = vmul.f32 %v4818_v22, %v5924_v53  ;;  %v2762_v31 = vmul.f32 %v4820_v48, %v5859_v57 }
 0x4c4   :  { %v2172_v35 = vcombine.low %v2147_v44, %v2155_v40  ;;  %v2188_v12 = vcombine.low %v2163_v13, %v2171_v63  ;;  %v2173_v41 = vcombine.high %v2147_v44, %v2155_v40  ;;  %v2189_v32 = vcombine.high %v2163_v13, %v2171_v63 }
 0x4c5   :  { %v2764_v53 = vmul.f32 %v4822_v19, %v5879_v24  ;;  %v2774_v34 = vpack.c.bf16 %v2763_v23, %v2762_v31  ;;  %v4824_v27 = vpop.eup %4823 }
 0x4c6   :  { %v2180_v7 = vrot.slane %v2172_v35, %v5201_v62  ;;  %v2196_v38 = vrot.slane %v2188_v12, %v5201_v62  ;;  %v2187_v20 = vrot.slane %v2173_v41, %v5201_v62  ;;  %v2203_v55 = vrot.slane %v2189_v32, %v5201_v62  ;;  %v4826_v36 = vpop.eup %4825 }
 0x4c7   :  { %v2769_v57 = vmul.f32 %v4824_v27, %v5936_v2  ;;  %v2768_v24 = vmul.f32 %v4826_v36, %v5908_v9 }
 0x4c8   :  { %v2204_v49 = vcombine.low %v2180_v7, %v2196_v38  ;;  %v2205_v51 = vcombine.high %v2180_v7, %v2196_v38  ;;  %v2206_v3 = vcombine.low %v2187_v20, %v2203_v55  ;;  %v2207_v39 = vcombine.high %v2187_v20, %v2203_v55 }
 0x4c9   :  { %v2777_v17 = vpack.c.bf16 %v2769_v57, %v2768_v24 }
 0x4ca   :  { %v2212_v0 = vpack.c.bf16 %v2204_v49, %v2136_v5  ;;  %v2213_v10 = vpack.c.bf16 %v2205_v51, %v2137_v14  ;;  %v2214_v8 = vpack.c.bf16 %v2206_v3, %v2138_v43  ;;  %v2215_v6 = vpack.c.bf16 %v2207_v39, %v2139_v47  ;;  %v4828_v14 = vpop.eup %4827 }
 0x4cb   :  { %v2775_v5 = vpack.c.bf16 %v2765_v28, %v2764_v53  ;;  %v2766_v47 = vmul.f32 %v4828_v14, %v5883_v21 }
 0x4cc   :  { %4587 = vmatpush3.bf16.msra.mxu1 %v2212_v0  ;;  %4593 = vmatpush3.bf16.msra.mxu0 %v2213_v10 }
 0x4cd   :  { %4598 = vmatprep.subr.bf16.mxu1 %v4985_v42  ;;  %4604 = vmatprep.subr.bf16.mxu0 %v4985_v42 }
 0x4cf   :  { %4589 = vmatmul.mubr.msk.bf16.vlgmr.msra.gmra.mxu1 %vm2593_vm2, %v2774_v34  ;;  %4595 = vmatmul.mubr.msk.bf16.vlgmr.msra.gmra.mxu0 %vm2593_vm2, %v2775_v5 }
 0x4d0   :  { %4599 = vmatpush3.bf16.msra.mxu1 %v2214_v8  ;;  %4605 = vmatpush3.bf16.msra.mxu0 %v2215_v6 }
 0x4d1   :  { %4606 = vmatprep.mubr.msk.bf16.mxu0 %vm4986_vm0, %v4985_v42  ;;  %4600 = vmatprep.mubr.msk.bf16.mxu1 %vm4986_vm0, %v4985_v42 }
 0x4d7   :  { %4607 = vmatmul.mubr.msk.bf16.vlgmr.msra.gmra.mxu0 %vm2593_vm2, %v2777_v17 }
 0x4d8   :  { %4056 = vmatprep.mubr.bf16.mxu0 %v4982_v30 }
 0x4e8   :  { %v2731_v50 = vpop.xlane.xlu1 %2730 }
 0x4e9   :  { %4829 = vrcp.f32 %v2731_v50 }
 0x4f6   :  { %v4830_v43 = vpop.eup %4829 }
 0x4f7   :  { %v2767_v2 = vmul.f32 %v4830_v43, %v5946_v37 }
 0x4f9   :  { %v2776_v59 = vpack.c.bf16 %v2767_v2, %v2766_v47 }
 0x4fb   :  { %4601 = vmatmul.mubr.msk.bf16.vlgmr.msra.gmra.mxu1 %vm2593_vm2, %v2776_v59 }
 0x522   :  { %v2815_v42 = vpop.f32.mrf.mxu1 }
 0x524   :  { %v4566_v9 = vpop.f32.mrf.mxu1 }
 0x526   :  { %v2818_v33 = vpop.f32.mrf.mxu1 }
 0x528   :  { %v4567_v18 = vpop.f32.mrf.mxu1 }
 0x52a   :  { %v2903_v29 = vpop.f32.mrf.mxu1 }
 0x52b   :  { %v3130_v54 = vcombine.low %v2815_v42, %v2903_v29  ;;  %v3131_v11 = vcombine.high %v2815_v42, %v2903_v29 }
 0x52c   :  { %v4578_v26 = vpop.f32.mrf.mxu1 }
 0x52d   :  { %v3138_v40 = vrot.slane %v3130_v54, %v5196_v56  ;;  %v3145_v13 = vrot.slane %v3131_v11, %v5196_v56 }
 0x52e   :  { %v2906_v25 = vpop.f32.mrf.mxu1 }
 0x52f   :  { %v3198_v12 = vcombine.low %v2818_v33, %v2906_v25  ;;  %v3199_v41 = vcombine.high %v2818_v33, %v2906_v25 }
 0x530   :  { %v4579_v60 = vpop.f32.mrf.mxu1 }
 0x531   :  { %v3206_v39 = vrot.slane %v3198_v12, %v5196_v56  ;;  %v3213_v23 = vrot.slane %v3199_v41, %v5196_v56 }
 0x541   :  { %v2859_v61 = vpop.f32.mrf.mxu0 }
 0x543   :  { %v4572_v58 = vpop.f32.mrf.mxu0 }
 0x545   :  { %v2862_v4 = vpop.f32.mrf.mxu0 }
 0x547   :  { %v4573_v45 = vpop.f32.mrf.mxu0 }
 0x549   :  { %v2947_v21 = vpop.f32.mrf.mxu0 }
 0x54a   :  { %v3146_v52 = vcombine.low %v2859_v61, %v2947_v21  ;;  %v3147_v37 = vcombine.high %v2859_v61, %v2947_v21 }
 0x54b   :  { %v4584_v44 = vpop.f32.mrf.mxu0 }
 0x54c   :  { %v3154_v63 = vrot.slane %v3146_v52, %v5196_v56  ;;  %v3161_v35 = vrot.slane %v3147_v37, %v5196_v56 }
 0x54d   :  { %v2950_v32 = vpop.f32.mrf.mxu0 }
 0x54e   :  { %v3162_v46 = vcombine.low %v3138_v40, %v3154_v63  ;;  %v3163_v22 = vcombine.high %v3138_v40, %v3154_v63  ;;  %v3178_v7 = vcombine.low %v3145_v13, %v3161_v35  ;;  %v3179_v38 = vcombine.high %v3145_v13, %v3161_v35 }
 0x54f   :  { %v3214_v20 = vcombine.low %v2862_v4, %v2950_v32  ;;  %v3215_v55 = vcombine.high %v2862_v4, %v2950_v32  ;;  %v4585_v48 = vpop.f32.mrf.mxu0 }
 0x550   :  { %v3170_v19 = vrot.slane %v3162_v46, %v5201_v62  ;;  %v3177_v49 = vrot.slane %v3163_v22, %v5201_v62  ;;  %v3186_v51 = vrot.slane %v3178_v7, %v5201_v62  ;;  %v3193_v3 = vrot.slane %v3179_v38, %v5201_v62  ;;  %v4711_v38 = vld [vmem:[#allocation7 + $0x38] sm:$0xff]  }
 0x551   :  { %v3222_v28 = vrot.slane %v3214_v20, %v5196_v56  ;;  %v3229_v0 = vrot.slane %v3215_v55, %v5196_v56  ;;  %v4712_v20 = vld [vmem:[#allocation7 + $0x30] sm:$0xff]   ;;  %4610 = vmatprep.subr.bf16.mxu1 %v4711_v38 }
 0x552   :  { %v3402_v10 = vcombine.low %v3170_v19, %v3177_v49  ;;  %v4364_v8 = vcombine.high %v3170_v19, %v3177_v49  ;;  %v3418_v6 = vcombine.low %v3186_v51, %v3193_v3  ;;  %v4365_v31 = vcombine.high %v3186_v51, %v3193_v3  ;;  %4611 = vmatpush3.bf16.msra.mxu1 %v4711_v38  ;;  %v4713_v51 = vld [vmem:[#allocation7 + $0x28] sm:$0xff]  }
 0x553   :  { %v3230_v53 = vcombine.low %v3206_v39, %v3222_v28  ;;  %v3231_v34 = vcombine.high %v3206_v39, %v3222_v28  ;;  %v3246_v5 = vcombine.low %v3213_v23, %v3229_v0  ;;  %v3247_v27 = vcombine.high %v3213_v23, %v3229_v0  ;;  %4612 = vmatprep.subr.bf16.mxu1 %v4712_v20  ;;  %v4714_v39 = vld [vmem:[#allocation7 + $0x20] sm:$0xff]   ;;  %v4715_v23 = vld [vmem:[#allocation7 + $0x18] sm:$0xff]  }
 0x554   :  { %v3409_v36 = vrot.slane %v3402_v10, %v5196_v56  ;;  %v3417_v57 = vrot.slane %v4364_v8, %v5196_v56  ;;  %v3425_v24 = vrot.slane %v3418_v6, %v5196_v56  ;;  %v3433_v17 = vrot.slane %v4365_v31, %v5196_v56 }
 0x555   :  { %v3238_v50 = vrot.slane %v3230_v53, %v5201_v62  ;;  %v3245_v14 = vrot.slane %v3231_v34, %v5201_v62  ;;  %v3254_v43 = vrot.slane %v3246_v5, %v5201_v62  ;;  %v3261_v47 = vrot.slane %v3247_v27, %v5201_v62 }
 0x556   :  { %v3435_v2 = vcombine.high %v3409_v36, %v3417_v57  ;;  %v3451_v59 = vcombine.high %v3425_v24, %v3433_v17  ;;  %v3434_v42 = vcombine.low %v3409_v36, %v3417_v57  ;;  %v3450_v9 = vcombine.low %v3425_v24, %v3433_v17  ;;  %4613 = vmatpush3.bf16.msra.mxu1 %v4712_v20 }
 0x557   :  { %v3470_v33 = vcombine.low %v3238_v50, %v3245_v14  ;;  %v4366_v18 = vcombine.high %v3238_v50, %v3245_v14  ;;  %v3486_v29 = vcombine.low %v3254_v43, %v3261_v47  ;;  %v4367_v26 = vcombine.high %v3254_v43, %v3261_v47  ;;  %4614 = vmatprep.subr.bf16.mxu1 %v4713_v51 }
 0x558   :  { %v6051_v25 = vrot.slane %v3434_v42, %v5201_v62  ;;  %v6054_v60 = vrot.slane %v3450_v9, %v5201_v62  ;;  %v3449_v54 = vrot.slane %v3435_v2, %v5201_v62  ;;  %v3465_v11 = vrot.slane %v3451_v59, %v5201_v62 }
 0x559   :  { %v3477_v61 = vrot.slane %v3470_v33, %v5196_v56  ;;  %v3485_v58 = vrot.slane %v4366_v18, %v5196_v56  ;;  %v3493_v4 = vrot.slane %v3486_v29, %v5196_v56  ;;  %v3501_v45 = vrot.slane %v4367_v26, %v5196_v56 }
 0x55a   :  { %v3466_v21 = vcombine.low %v6051_v25, %v6054_v60  ;;  %v3468_v41 = vcombine.low %v3449_v54, %v3465_v11  ;;  %v3467_v46 = vcombine.high %v6051_v25, %v6054_v60  ;;  %v3469_v49 = vcombine.high %v3449_v54, %v3465_v11  ;;  %4615 = vmatpush3.bf16.msra.mxu1 %v4713_v51 }
 0x55b   :  { %v3503_v52 = vcombine.high %v3477_v61, %v3485_v58  ;;  %v3519_v37 = vcombine.high %v3493_v4, %v3501_v45  ;;  %v3502_v44 = vcombine.low %v3477_v61, %v3485_v58  ;;  %v3518_v40 = vcombine.low %v3493_v4, %v3501_v45  ;;  %4616 = vmatprep.subr.bf16.mxu1 %v4714_v39 }
 0x55d   :  { %v3517_v13 = vrot.slane %v3503_v52, %v5201_v62  ;;  %v3533_v63 = vrot.slane %v3519_v37, %v5201_v62  ;;  %v6067_v35 = vrot.slane %v3502_v44, %v5201_v62  ;;  %v6070_v12 = vrot.slane %v3518_v40, %v5201_v62 }
 0x55e   :  { %4617 = vmatpush3.bf16.msra.mxu1 %v4714_v39 }
 0x55f   :  { %v3536_v32 = vcombine.low %v3517_v13, %v3533_v63  ;;  %v3535_v22 = vcombine.high %v6067_v35, %v6070_v12  ;;  %v3534_v7 = vcombine.low %v6067_v35, %v6070_v12  ;;  %v3537_v19 = vcombine.high %v3517_v13, %v3533_v63  ;;  %4618 = vmatprep.subr.bf16.mxu1 %v4715_v23 }
 0x561   :  { %v4654_v55 = vpack.i.bf16 %v3536_v32, %v3468_v41  ;;  %v4649_v48 = vpack.i.bf16 %v3535_v22, %v3467_v46  ;;  %v4659_v3 = vpack.i.bf16 %v3537_v19, %v3469_v49 }
 0x562   :  { %4619 = vmatpush3.bf16.msra.mxu1 %v4715_v23 }
 0x563   :  { %4655 = vrot.lane.b32.xlu1 %v4654_v55, %s4979_s5  ;;  %4650 = vrot.lane.b32.xlu0 %v4649_v48, %s4984_s2 }
 0x567   :  { %4660 = vrot.lane.b32.xlu0 %v4659_v3, %s4983_s16 }
 0x58f   :  { %v2991_v28 = vpop.f32.mrf.mxu1  ;;  %v3035_v0 = vpop.f32.mrf.mxu0 }
 0x591   :  { %v4590_v10 = vpop.f32.mrf.mxu1  ;;  %v4596_v8 = vpop.f32.mrf.mxu0 }
 0x593   :  { %v2994_v6 = vpop.f32.mrf.mxu1  ;;  %v3038_v31 = vpop.f32.mrf.mxu0 }
 0x595   :  { %v4591_v53 = vpop.f32.mrf.mxu1  ;;  %v4597_v34 = vpop.f32.mrf.mxu0 }
 0x597   :  { %v3123_v5 = vpop.f32.mrf.mxu0 }
 0x598   :  { %v3282_v24 = vcombine.low %v3035_v0, %v3123_v5  ;;  %v3283_v17 = vcombine.high %v3035_v0, %v3123_v5 }
 0x599   :  { %v4608_v27 = vpop.f32.mrf.mxu0 }
 0x59a   :  { %v3290_v2 = vrot.slane %v3282_v24, %v5196_v56  ;;  %v3297_v59 = vrot.slane %v3283_v17, %v5196_v56  ;;  %v4716_v24 = vld [vmem:[#allocation7 + $0x10] sm:$0xff]  }
 0x59b   :  { %v3126_v36 = vpop.f32.mrf.mxu0  ;;  %4620 = vmatprep.subr.bf16.mxu1 %v4716_v24 }
 0x59c   :  { %v3350_v33 = vcombine.low %v3038_v31, %v3126_v36  ;;  %v3351_v18 = vcombine.high %v3038_v31, %v3126_v36  ;;  %4621 = vmatpush3.bf16.msra.mxu1 %v4716_v24 }
 0x59d   :  { %v4609_v57 = vpop.f32.mrf.mxu0 }
 0x59e   :  { %v3358_v13 = vrot.slane %v3350_v33, %v5196_v56  ;;  %v3365_v63 = vrot.slane %v3351_v18, %v5196_v56 }
 0x5bb   :  { %v3079_v50 = vpop.f32.mrf.mxu1 }
 0x5bc   :  { %v3266_v14 = vcombine.low %v2991_v28, %v3079_v50  ;;  %v3267_v43 = vcombine.high %v2991_v28, %v3079_v50 }
 0x5bd   :  { %v4602_v47 = vpop.f32.mrf.mxu1 }
 0x5be   :  { %v3274_v42 = vrot.slane %v3266_v14, %v5196_v56  ;;  %v3281_v9 = vrot.slane %v3267_v43, %v5196_v56 }
 0x5bf   :  { %v3082_v29 = vpop.f32.mrf.mxu1 }
 0x5c0   :  { %v3298_v26 = vcombine.low %v3274_v42, %v3290_v2  ;;  %v3299_v61 = vcombine.high %v3274_v42, %v3290_v2  ;;  %v3314_v58 = vcombine.low %v3281_v9, %v3297_v59  ;;  %v3315_v4 = vcombine.high %v3281_v9, %v3297_v59 }
 0x5c1   :  { %v3334_v45 = vcombine.low %v2994_v6, %v3082_v29  ;;  %v3335_v54 = vcombine.high %v2994_v6, %v3082_v29  ;;  %v4603_v11 = vpop.f32.mrf.mxu1  ;;  %v4717_v29 = vld [vmem:[#allocation7 + $0x8] sm:$0xff]  }
 0x5c2   :  { %v3306_v52 = vrot.slane %v3298_v26, %v5201_v62  ;;  %v3313_v37 = vrot.slane %v3299_v61, %v5201_v62  ;;  %v3322_v44 = vrot.slane %v3314_v58, %v5201_v62  ;;  %v3329_v40 = vrot.slane %v3315_v4, %v5201_v62  ;;  %4622 = vmatprep.subr.bf16.mxu1 %v4717_v29 }
 0x5c3   :  { %v3342_v41 = vrot.slane %v3334_v45, %v5196_v56  ;;  %v3349_v32 = vrot.slane %v3335_v54, %v5196_v56  ;;  %4623 = vmatpush3.bf16.msra.mxu1 %v4717_v29  ;;  %v4840_v29 = vld [vmem:[#allocation2 + $0x8] sm:$0xff] }
 0x5c4   :  { %v3538_v46 = vcombine.low %v3306_v52, %v3313_v37  ;;  %v4368_v22 = vcombine.high %v3306_v52, %v3313_v37  ;;  %v3554_v38 = vcombine.low %v3322_v44, %v3329_v40  ;;  %v4369_v20 = vcombine.high %v3322_v44, %v3329_v40  ;;  %v4718_v40 = vld [vmem:[#allocation7] sm:$0xff]  }
 0x5c5   :  { %v3366_v55 = vcombine.low %v3342_v41, %v3358_v13  ;;  %v3367_v48 = vcombine.high %v3342_v41, %v3358_v13  ;;  %v3382_v19 = vcombine.low %v3349_v32, %v3365_v63  ;;  %v3383_v49 = vcombine.high %v3349_v32, %v3365_v63  ;;  %4624 = vmatprep.subr.bf16.mxu1 %v4718_v40 }
 0x5c6   :  { %v3545_v51 = vrot.slane %v3538_v46, %v5196_v56  ;;  %v3553_v3 = vrot.slane %v4368_v22, %v5196_v56  ;;  %v3561_v39 = vrot.slane %v3554_v38, %v5196_v56  ;;  %v3569_v23 = vrot.slane %v4369_v20, %v5196_v56 }
 0x5c7   :  { %v3374_v28 = vrot.slane %v3366_v55, %v5201_v62  ;;  %v3381_v0 = vrot.slane %v3367_v48, %v5201_v62  ;;  %v3390_v10 = vrot.slane %v3382_v19, %v5201_v62  ;;  %v3397_v8 = vrot.slane %v3383_v49, %v5201_v62  ;;  %4625 = vmatpush3.bf16.msra.mxu1 %v4718_v40 }
 0x5c8   :  { %v3570_v6 = vcombine.low %v3545_v51, %v3553_v3  ;;  %v3586_v31 = vcombine.low %v3561_v39, %v3569_v23  ;;  %v3571_v2 = vcombine.high %v3545_v51, %v3553_v3  ;;  %v3587_v59 = vcombine.high %v3561_v39, %v3569_v23 }
 0x5c9   :  { %v3606_v53 = vcombine.low %v3374_v28, %v3381_v0  ;;  %v4370_v34 = vcombine.high %v3374_v28, %v3381_v0  ;;  %v3622_v5 = vcombine.low %v3390_v10, %v3397_v8  ;;  %v4371_v27 = vcombine.high %v3390_v10, %v3397_v8 }
 0x5ca   :  { %v6102_v36 = vrot.slane %v3570_v6, %v5201_v62  ;;  %v6105_v57 = vrot.slane %v3586_v31, %v5201_v62  ;;  %v3585_v4 = vrot.slane %v3571_v2, %v5201_v62  ;;  %v3601_v52 = vrot.slane %v3587_v59, %v5201_v62  ;;  %v4839_v59 = vld [vmem:[#allocation2] sm:$0xff] }
 0x5cb   :  { %v3613_v17 = vrot.slane %v3606_v53, %v5196_v56  ;;  %v3621_v50 = vrot.slane %v4370_v34, %v5196_v56  ;;  %v3629_v14 = vrot.slane %v3622_v5, %v5196_v56  ;;  %v3637_v43 = vrot.slane %v4371_v27, %v5196_v56 }
 0x5cc   :  { %v3602_v47 = vcombine.low %v6102_v36, %v6105_v57  ;;  %v3603_v45 = vcombine.high %v6102_v36, %v6105_v57  ;;  %v3604_v13 = vcombine.low %v3585_v4, %v3601_v52  ;;  %v3605_v19 = vcombine.high %v3585_v4, %v3601_v52 }
 0x5cd   :  { %v3638_v42 = vcombine.low %v3613_v17, %v3621_v50  ;;  %v3654_v9 = vcombine.low %v3629_v14, %v3637_v43  ;;  %v3639_v33 = vcombine.high %v3613_v17, %v3621_v50  ;;  %v3655_v18 = vcombine.high %v3629_v14, %v3637_v43  ;;  %v4372_v14 = vld [vmem:[%s6194_s4] ss:$0 sm:$0xff] }
 0x5cf   :  { %v3646_v26 = vrot.slane %v3638_v42, %v5201_v62  ;;  %v3662_v61 = vrot.slane %v3654_v9, %v5201_v62  ;;  %v3653_v58 = vrot.slane %v3639_v33, %v5201_v62  ;;  %v3669_v56 = vrot.slane %v3655_v18, %v5201_v62 }
 0x5d1   :  { %v3671_v54 = vcombine.high %v3646_v26, %v3662_v61  ;;  %v3670_v11 = vcombine.low %v3646_v26, %v3662_v61  ;;  %v3672_v44 = vcombine.low %v3653_v58, %v3669_v56  ;;  %v3673_v38 = vcombine.high %v3653_v58, %v3669_v56  ;;  %v4841_v56 = vld [vmem:[#allocation2 + $0x18] sm:$0xff] }
 0x5d3   :  { %v4664_v37 = vpack.i.bf16 %v3671_v54, %v3603_v45  ;;  %v4669_v22 = vpack.i.bf16 %v3672_v44, %v3604_v13  ;;  %v4674_v39 = vpack.i.bf16 %v3673_v38, %v3605_v19  ;;  %v4842_v54 = vld [vmem:[#allocation2 + $0x10] sm:$0xff]  ;;  %v4722_v13 = vld [vmem:[#allocation8 + $0x60] ss:$8 sps:$4 sm:$0xff]  }
 0x5d4   :  { %v4721_v44 = vld [vmem:[#allocation8 + $0x74] ss:$8 sps:$4 sm:$0xff]   ;;  %v4731_v38 = vld [vmem:[#allocation8 + $0x30] ss:$8 sps:$4 sm:$0xff]  }
 0x5d5   :  { %4665 = vrot.lane.b32.xlu1 %v4664_v37, %s4984_s2  ;;  %v4651_v63 = vpop.permute.xlu0 %4650  ;;  %v4656_v41 = vpop.permute.xlu1 %4655  ;;  %v4719_v37 = vld [vmem:[#allocation8 + $0x70] ss:$8 sps:$4 sm:$0xff]   ;;  %4024 = vmatprep.subr.bf16.mxu0 %v4721_v44 }
 0x5d6   :  { %v4653_v32 = vunpack.i.h.bf16 %v4651_v63  ;;  %v4652_v46 = vunpack.i.l.bf16 %v4651_v63  ;;  %v4658_v20 = vunpack.i.h.bf16 %v4656_v41  ;;  %v4657_v55 = vunpack.i.l.bf16 %v4656_v41  ;;  %4025 = vmatpush1.bf16.msra.mxu0 %v4719_v37  ;;  %v4724_v63 = vld [vmem:[#allocation8 + $0x64] ss:$8 sps:$4 sm:$0xff]   ;;  %v4725_v41 = vld [vmem:[#allocation8 + $0x50] ss:$8 sps:$4 sm:$0xff]  }
 0x5d7   :  { %4026 = vmatprep.subr.bf16.mxu0 %v4724_v63  ;;  %v4737_v19 = vld [vmem:[#allocation8 + $0x10] ss:$8 sps:$4 sm:$0xff]  }
 0x5d8   :  { %v3722_v62 = vsel %vm2216_vm1, %v3466_v21, %v4652_v46  ;;  %v3723_v48 = vsel %vm2216_vm1, %v3534_v7, %v4653_v32  ;;  %v4727_v32 = vld [vmem:[#allocation8 + $0x54] ss:$8 sps:$4 sm:$0xff]   ;;  %v4728_v46 = vld [vmem:[#allocation8 + $0x40] ss:$8 sps:$4 sm:$0xff]  }
 0x5d9   :  { %4670 = vrot.lane.b32.xlu1 %v4669_v22, %s4979_s5  ;;  %v4661_v49 = vpop.permute.xlu0 %4660  ;;  %v3728_v23 = vsel %vm3726_vm3, %v3723_v48, %v4658_v20  ;;  %v3727_v25 = vsel %vm3726_vm3, %v3722_v62, %v4657_v55  ;;  %v4730_v22 = vld [vmem:[#allocation8 + $0x44] ss:$8 sps:$4 sm:$0xff]   ;;  %v4733_v20 = vld [vmem:[#allocation8 + $0x34] ss:$8 sps:$4 sm:$0xff]   ;;  %v4734_v62 = vld [vmem:[#allocation8 + $0x20] ss:$8 sps:$4 sm:$0xff]  }
 0x5da   :  { %v4663_v51 = vunpack.i.h.bf16 %v4661_v49  ;;  %v4662_v3 = vunpack.i.l.bf16 %v4661_v49  ;;  %4027 = vmatpush1.bf16.msra.mxu0 %v4722_v13  ;;  %v4736_v55 = vld [vmem:[#allocation8 + $0x24] ss:$8 sps:$4 sm:$0xff]   ;;  %v4739_v48 = vld [vmem:[#allocation8 + $0x14] ss:$8 sps:$4 sm:$0xff]  }
 0x5db   :  { %4028 = vmatprep.subr.bf16.mxu0 %v4727_v32  ;;  %v4742_v49 = vld [vmem:[#allocation8 + $0x4] ss:$8 sps:$4 sm:$0xff]  }
 0x5dc   :  { %v3732_v60 = vsel %vm3731_vm4, %v3727_v25, %v4662_v3  ;;  %v3733_v21 = vsel %vm3731_vm4, %v3728_v23, %v4663_v51  ;;  %v4740_v51 = vld [vmem:[#allocation8] ss:$8 sps:$4 sm:$0xff]   ;;  %v4743_v3 = vld [vmem:[#allocation10 + $0x78] sm:$0xff]   ;;  %v4745_v23 = vld [vmem:[#allocation10 + $0x70] sm:$0xff]  }
 0x5dd   :  { %4675 = vrot.lane.b32.xlu1 %v4674_v39, %s4983_s16  ;;  %v3736_v35 = vpack.c.bf16 %v3733_v21, %v3732_v60  ;;  %v4744_v39 = vld [vmem:[#allocation10 + $0x38] sm:$0xff]   ;;  %4466 = vmatprep.subr.bf16.mxu1 %v4743_v3  ;;  %v4746_v25 = vld [vmem:[#allocation10 + $0x30] sm:$0xff]   ;;  %v4747_v60 = vld [vmem:[#allocation10 + $0x68] sm:$0xff]  }
 0x5de   :  { %4029 = vmatpush1.bf16.msra.mxu0 %v4725_v41  ;;  %v4748_v21 = vld [vmem:[#allocation10 + $0x28] sm:$0xff]   ;;  %v4757_v3 = vld [vmem:[#allocation10 + $0x40] sm:$0xff]  }
 0x5df   :  { %4626 = vmatprep.mubr.bf16.mxu1 %v3736_v35  ;;  %4030 = vmatprep.subr.bf16.mxu0 %v4730_v22  ;;  %v4749_v35 = vld [vmem:[#allocation10 + $0x60] sm:$0xff]  }
 0x5e2   :  { %4031 = vmatpush1.bf16.msra.mxu0 %v4728_v46 }
 0x5e3   :  { %4032 = vmatprep.subr.bf16.mxu0 %v4733_v20 }
 0x5e6   :  { %4033 = vmatpush1.bf16.msra.mxu0 %v4731_v38 }
 0x5e7   :  { %4034 = vmatprep.subr.bf16.mxu0 %v4736_v55 }
 0x5ea   :  { %4035 = vmatpush1.bf16.msra.mxu0 %v4734_v62 }
 0x5eb   :  { %4036 = vmatprep.subr.bf16.mxu0 %v4739_v48  ;;  %v4753_v48 = vld [vmem:[#allocation10 + $0x50] sm:$0xff]  }
 0x5ee   :  { %4037 = vmatpush1.bf16.msra.mxu0 %v4737_v19  ;;  %v4754_v19 = vld [vmem:[#allocation10 + $0x10] sm:$0xff]  }
 0x5ef   :  { %4038 = vmatprep.subr.bf16.mxu0 %v4742_v49  ;;  %v4755_v49 = vld [vmem:[#allocation10 + $0x48] sm:$0xff]  }
 0x5f2   :  { %4039 = vmatpush1.bf16.msra.mxu0 %v4740_v51  ;;  %v4756_v51 = vld [vmem:[#allocation10 + $0x8] sm:$0xff]  }
 0x647   :  { %v4666_v12 = vpop.permute.xlu1 %4665 }
 0x648   :  { %v4668_v28 = vunpack.i.h.bf16 %v4666_v12  ;;  %v4667_v0 = vunpack.i.l.bf16 %v4666_v12  ;;  %v4750_v12 = vld [vmem:[#allocation10 + $0x20] sm:$0xff]  }
 0x64a   :  { %v3725_v31 = vsel %vm2216_vm1, %v3670_v11, %v4668_v28  ;;  %v3724_v53 = vsel %vm2216_vm1, %v3602_v47, %v4667_v0  ;;  %v4752_v28 = vld [vmem:[#allocation10 + $0x18] sm:$0xff]  }
 0x64b   :  { %v4671_v7 = vpop.permute.xlu1 %4670 }
 0x64c   :  { %v4673_v10 = vunpack.i.h.bf16 %v4671_v7  ;;  %v4672_v8 = vunpack.i.l.bf16 %v4671_v7  ;;  %v4751_v7 = vld [vmem:[#allocation10 + $0x58] sm:$0xff]  }
 0x64e   :  { %v3729_v27 = vsel %vm3726_vm3, %v3724_v53, %v4672_v8  ;;  %v3730_v36 = vsel %vm3726_vm3, %v3725_v31, %v4673_v10 }
 0x64f   :  { %v4676_v6 = vpop.permute.xlu1 %4675 }
 0x650   :  { %v4678_v34 = vunpack.i.h.bf16 %v4676_v6  ;;  %v4677_v5 = vunpack.i.l.bf16 %v4676_v6 }
 0x652   :  { %v3734_v57 = vsel %vm3731_vm4, %v3729_v27, %v4677_v5  ;;  %v3735_v24 = vsel %vm3731_vm4, %v3730_v36, %v4678_v34 }
 0x653   :  { %v3737_v17 = vpack.c.bf16 %v3735_v24, %v3734_v57 }
 0x655   :  { %4627 = vmatmul.mubr.bf16.vlgmr.msra.gmra.mxu1 %v3737_v17 }
 0x656   :  { %4467 = vmatpush3.bf16.msra.mxu1 %v4744_v39  ;;  %v4758_v39 = vld [vmem:[#allocation10] sm:$0xff]  }
 0x657   :  { %4468 = vmatprep.subr.bf16.mxu1 %v4745_v23 }
 0x65a   :  { %4469 = vmatpush3.bf16.msra.mxu1 %v4746_v25 }
 0x65b   :  { %4470 = vmatprep.subr.bf16.mxu1 %v4747_v60 }
 0x65e   :  { %4471 = vmatpush3.bf16.msra.mxu1 %v4748_v21 }
 0x65f   :  { %4472 = vmatprep.subr.bf16.mxu1 %v4749_v35 }
 0x662   :  { %4473 = vmatpush3.bf16.msra.mxu1 %v4750_v12 }
 0x663   :  { %4474 = vmatprep.subr.bf16.mxu1 %v4751_v7 }
 0x666   :  { %4475 = vmatpush3.bf16.msra.mxu1 %v4752_v28 }
 0x667   :  { %4476 = vmatprep.subr.bf16.mxu1 %v4753_v48 }
 0x66a   :  { %4477 = vmatpush3.bf16.msra.mxu1 %v4754_v19 }
 0x66b   :  { %4478 = vmatprep.subr.bf16.mxu1 %v4755_v49 }
 0x66e   :  { %4479 = vmatpush3.bf16.msra.mxu1 %v4756_v51 }
 0x66f   :  { %4480 = vmatprep.subr.bf16.mxu1 %v4757_v3 }
 0x672   :  { %4481 = vmatpush3.bf16.msra.mxu1 %v4758_v39 }
 0x715   :  { %v4628_v50 = vpop.f32.mrf.mxu1 }
 0x716   :  { %v3852_v58 = vadd.f32 %v4628_v50, %v4372_v14 }
 0x717   :  { %v3843_v43 = vpop.f32.mrf.mxu1 }
 0x718   :  { %v3844_v2 = vadd.f32 %v4372_v14, %v3843_v43  ;;  %v6158_v11 = vadd.f32 %v4842_v54, %v3852_v58 }
 0x719   :  { %v4629_v47 = vpop.f32.mrf.mxu1 }
 0x71a   :  { %v6145_v42 = vadd.f32 %v4839_v59, %v3844_v2  ;;  %v3855_v18 = vadd.f32 %v4629_v47, %v4372_v14  ;;  %v3876_v40 = vmul.f32 %v6158_v11, %v6158_v11 }
 0x71b   :  { %v3846_v9 = vpop.f32.mrf.mxu1 }
 0x71c   :  { %v3847_v33 = vadd.f32 %v4372_v14, %v3846_v9  ;;  %3862 = vadd.xlane.f32.xlu0 %v6145_v42  ;;  %v3874_v61 = vmul.f32 %v6145_v42, %v6145_v42  ;;  %v6153_v4 = vadd.f32 %v4841_v56, %v3855_v18 }
 0x71e   :  { %v6148_v26 = vadd.f32 %v4840_v29, %v3847_v33  ;;  %v3877_v52 = vmul.f32 %v6153_v4, %v6153_v4 }
 0x720   :  { %3864 = vadd.xlane.f32.xlu1 %v6148_v26  ;;  %3878 = vadd.xlane.f32.xlu0 %v3874_v61  ;;  %v3875_v45 = vmul.f32 %v6148_v26, %v6148_v26 }
 0x724   :  { %3868 = vadd.xlane.f32.xlu1 %v6153_v4  ;;  %3880 = vadd.xlane.f32.xlu0 %v3875_v45 }
 0x728   :  { %3884 = vadd.xlane.f32.xlu1 %v3877_v52  ;;  %3866 = vadd.xlane.f32.xlu0 %v6158_v11 }
 0x72c   :  { %3882 = vadd.xlane.f32.xlu0 %v3876_v40 }
 0x7a5   :  { %v3863_v0 = vpop.xlane.xlu0 %3862 }
 0x7a6   :  { %v3870_v10 = vmul.f32 0.0078125, %v3863_v0 }
 0x7a8   :  { %v3890_v31 = vmul.f32 %v3870_v10, %v3870_v10  ;;  %v3898_v37 = vsub.f32 %v6145_v42, %v3870_v10 }
 0x7a9   :  { %v3865_v8 = vpop.xlane.xlu1 %3864  ;;  %v3879_v6 = vpop.xlane.xlu0 %3878 }
 0x7aa   :  { %v3871_v53 = vmul.f32 0.0078125, %v3865_v8  ;;  %v3886_v34 = vmul.f32 0.0078125, %v3879_v6 }
 0x7ac   :  { %v3894_v5 = vsub.f32 %v3886_v34, %v3890_v31  ;;  %v3891_v57 = vmul.f32 %v3871_v53, %v3871_v53  ;;  %v3899_v44 = vsub.f32 %v6148_v26, %v3871_v53 }
 0x7ad   :  { %v3869_v27 = vpop.xlane.xlu1 %3868  ;;  %v3881_v36 = vpop.xlane.xlu0 %3880 }
 0x7ae   :  { %v3902_v24 = vadd.f32 1e-06, %v3894_v5  ;;  %v3873_v17 = vmul.f32 0.0078125, %v3869_v27  ;;  %v3887_v50 = vmul.f32 0.0078125, %v3881_v36 }
 0x7b0   :  { %v3895_v14 = vsub.f32 %v3887_v50, %v3891_v57  ;;  %4831 = vrsqrt.f32 %v3902_v24  ;;  %v3893_v47 = vmul.f32 %v3873_v17, %v3873_v17  ;;  %v3901_v46 = vsub.f32 %v6153_v4, %v3873_v17 }
 0x7b1   :  { %v3885_v43 = vpop.xlane.xlu1 %3884  ;;  %v3867_v2 = vpop.xlane.xlu0 %3866 }
 0x7b2   :  { %v3903_v59 = vadd.f32 1e-06, %v3895_v14  ;;  %v3889_v9 = vmul.f32 0.0078125, %v3885_v43  ;;  %v3872_v33 = vmul.f32 0.0078125, %v3867_v2 }
 0x7b4   :  { %4833 = vrsqrt.f32 %v3903_v59  ;;  %v3897_v18 = vsub.f32 %v3889_v9, %v3893_v47  ;;  %v3892_v58 = vmul.f32 %v3872_v33, %v3872_v33  ;;  %v3900_v22 = vsub.f32 %v6158_v11, %v3872_v33  ;;  %v4397_v33 = vld [vmem:[%s6198_s8] ss:$0 sm:$0xff]  ;;  %s4989_s8 = smov [#allocation11]  }
 0x7b5   :  { %v3883_v29 = vpop.xlane.xlu0 %3882  ;;  %s4286_s23 = sshll.u32 %s4989_s8, 4  ;;  %s4287_s23 = int_to_ptr.vmem [resolvable:$true] %s4286_s23 }
 0x7b6   :  { %v3905_v61 = vadd.f32 1e-06, %v3897_v18  ;;  %v3888_v56 = vmul.f32 0.0078125, %v3883_v29  ;;  %s4943_s24 = scalar_lea.vmem %s4287_s23, 512  ;;  %p4948_p12 = scmp.lt.s32.totalorder %s4287_s23, %s4287_s23 }
 0x7b7   :  { %p4944_p11 = scmp.ne.s32.totalorder %s4287_s23, %s4943_s24  ;;  %p4949_p13 = scmp.lt.s32.totalorder %s4943_s24, %s4943_s24 }
 0x7b8   :  { %v3896_v45 = vsub.f32 %v3888_v56, %v3892_v58  ;;  %4835 = vrsqrt.f32 %v3905_v61 }
 0x7b9   :  { %p4950_p0 = por %p4949_p13, %p4948_p12 }
 0x7ba   :  { %v3904_v54 = vadd.f32 1e-06, %v3896_v45 }
 0x7bb   :  { %p4951_p1 = pnand %p4950_p0, %p4944_p11 }
 0x7bc   :  { %4837 = vrsqrt.f32 %v3904_v54 }
 0x7bd   :  { %v4832_v52 = vpop.eup %4831 }
 0x7be   :  { %v3910_v13 = vmul.f32 %v4832_v52, %v3898_v37 }
 0x7c1   :  { %v4834_v40 = vpop.eup %4833 }
 0x7c2   :  { %v3911_v63 = vmul.f32 %v4834_v40, %v3899_v44 }
 0x7c4   :  { %v3914_v41 = vpack.c.bf16 %v3911_v63, %v3910_v13 }
 0x7c5   :  { %v4836_v32 = vpop.eup %4835 }
 0x7c6   :  { %4057 = vmatmul.mubr.bf16.vlgmr.msra.gmra.mxu0 %v3914_v41  ;;  %v3913_v55 = vmul.f32 %v4836_v32, %v3901_v46 }
 0x7c7   :  { %4066 = vmatprep.mubr.bf16.mxu0 %v4982_v30  ;;  %v3932_v30 = vld [vmem:[%s6196_s6] sm:$0x3] }
 0x7c8   :  { %v3941_v25 = vrot.slane %v3932_v30, %v201_v16  ;;  %v3937_v60 = vrot.slane %v3932_v30, %v197_v15 }
 0x7c9   :  { %v4838_v38 = vpop.eup %4837 }
 0x7ca   :  { %v3912_v20 = vmul.f32 %v4838_v38, %v3900_v22 }
 0x7cc   :  { %v3915_v62 = vpack.c.bf16 %v3913_v55, %v3912_v20 }
 0x7ce   :  { %4067 = vmatmul.mubr.bf16.gmra.mxu0 %v3915_v62 }
 0x886   :  { %v4058_v23 = vpop.f32.mrf.mxu0 }
 0x887   :  { %v4059_v28 = vadd.f32 %v4058_v23, %v3937_v60 }
 0x888   :  { %v4060_v21 = vpop.f32.mrf.mxu0 }
 0x889   :  { %v4061_v12 = vadd.f32 %v4060_v21, %v3941_v25  ;;  %v4077_v34 = vmax.f32 %v4059_v28, 0.0 }
 0x88a   :  { %v4062_v35 = vpop.f32.mrf.mxu0 }
 0x88b   :  { %v4063_v7 = vadd.f32 %v4062_v35, %v3937_v60  ;;  %v4078_v31 = vmax.f32 %v4061_v12, 0.0 }
 0x88c   :  { %v4064_v0 = vpop.f32.mrf.mxu0 }
 0x88d   :  { %v4065_v10 = vadd.f32 %v4064_v0, %v3941_v25  ;;  %v4079_v8 = vmax.f32 %v4063_v7, 0.0 }
 0x88e   :  { %v4068_v6 = vpop.f32.mrf.mxu0 }
 0x88f   :  { %v4080_v53 = vmax.f32 %v4065_v10, 0.0  ;;  %v4085_v36 = vpack.c.bf16 %v4079_v8, %v4077_v34  ;;  %v4069_v1 = vadd.f32 %v4068_v6, %v3937_v60 }
 0x890   :  { %v4070_v5 = vpop.f32.mrf.mxu0 }
 0x891   :  { %v4086_v27 = vpack.c.bf16 %v4080_v53, %v4078_v31  ;;  %v4071_v16 = vadd.f32 %v4070_v5, %v3941_v25  ;;  %v4081_v2 = vmax.f32 %v4069_v1, 0.0 }
 0x892   :  { %v4072_v57 = vpop.f32.mrf.mxu0 }
 0x893   :  { %v4073_v24 = vadd.f32 %v4072_v57, %v3937_v60  ;;  %4256 = vmatprep.mubr.bf16.mxu1 %v4086_v27  ;;  %v4082_v14 = vmax.f32 %v4071_v16, 0.0 }
 0x894   :  { %v4074_v15 = vpop.f32.mrf.mxu0  ;;  %4257 = vmatmul.mubr.bf16.vlgmr.msra.gmra.mxu1 %v4085_v36 }
 0x895   :  { %v4075_v17 = vadd.f32 %v4074_v15, %v3941_v25  ;;  %v4083_v50 = vmax.f32 %v4073_v24, 0.0 }
 0x897   :  { %v4084_v43 = vmax.f32 %v4075_v17, 0.0  ;;  %v4087_v59 = vpack.c.bf16 %v4083_v50, %v4081_v2 }
 0x899   :  { %v4088_v47 = vpack.c.bf16 %v4084_v43, %v4082_v14 }
 0x89b   :  { %4264 = vmatprep.mubr.bf16.mxu1 %v4088_v47 }
 0x89c   :  { %4265 = vmatmul.mubr.bf16.gmra.mxu1 %v4087_v59 }
 0x954   :  { %v4482_v9 = vpop.f32.mrf.mxu1 }
 0x956   :  { %v4483_v18 = vpop.f32.mrf.mxu1 }
 0x957   :  { %v4484_v29 = vadd.f32 %v4483_v18, %v4482_v9 }
 0x958   :  { %v4485_v61 = vpop.f32.mrf.mxu1 }
 0x959   :  { %v4259_v58 = vadd.f32 %v4484_v29, %v4397_v33 }
 0x95a   :  { %v4486_v56 = vpop.f32.mrf.mxu1 }
 0x95b   :  { %v4273_v45 = vadd.f32 %v4259_v58, %v6145_v42  ;;  %v4487_v54 = vadd.f32 %v4486_v56, %v4485_v61 }
 0x95c   :  { %v4488_v52 = vpop.f32.mrf.mxu1 }
 0x95d   :  { %4277 = vst [vmem:[#allocation11] sm:$0xff] %v4273_v45  ;;  %v4262_v37 = vadd.f32 %v4487_v54, %v4397_v33 }
 0x95e   :  { %v4489_v44 = vpop.f32.mrf.mxu1 }
 0x95f   :  { %v4274_v40 = vadd.f32 %v4262_v37, %v6148_v26  ;;  %v4490_v13 = vadd.f32 %v4489_v44, %v4488_v52 }
 0x960   :  { %v4491_v63 = vpop.f32.mrf.mxu1 }
 0x961   :  { %4278 = vst [vmem:[#allocation11 + $0x8] sm:$0xff] %v4274_v40  ;;  %v4267_v41 = vadd.f32 %v4490_v13, %v4397_v33 }
 0x962   :  { %v4492_v32 = vpop.f32.mrf.mxu1 }
 0x963   :  { %v4275_v46 = vadd.f32 %v4267_v41, %v6158_v11  ;;  %v4493_v22 = vadd.f32 %v4492_v32, %v4491_v63 }
 0x965   :  { %4279 = vst [vmem:[#allocation11 + $0x10] sm:$0xff] %v4275_v46  ;;  %v4270_v38 = vadd.f32 %v4493_v22, %v4397_v33 }
 0x967   :  { %v4276_v42 = vadd.f32 %v4270_v38, %v6153_v4 }
 0x969   :  { %4280 = vst [vmem:[#allocation11 + $0x18] sm:$0xff] %v4276_v42 }
 0x96a   :  { %4954 = shalt.err (!%p4951_p1)
}
 0x96b   :  { %4292 = dma.vmem_to_hbm [thread:$0]  %s4287_s23, 512, %s6199_s9, [#allocation4], %s4976_s21, %s4976_s21, %s4977_s22  }
 0x96c   :  { %4969 = dma.done.wait [#allocation4], 512  }
 0x96d   :  { %4970 = vsyncadd [#allocation4], 4294966784 }
 0x96e   :  { %4296 = vsyncpa [#allocation3], 1 }
 0x96f   :  { %4297 = vsyncpa [#allocation6], 1 }
 0x970   :  { %4298 = vsyncpa [#allocation9], 1 }
 0x971   :  { %4299 = vsyncpa [#allocation4], 1 }

</bundles_post_ra>
